<compile_context>
chip_gen: v7x
topology: tpu7x:2x2x1
jax: 0.10.0
libtpu: 0.0.40
codegen_flags: <defaults>
</compile_context>

<pallas_src>
import functools
import math

import jax
import jax.numpy as jnp
from jax.experimental import pallas as pl
from jax.experimental.pallas import tpu as pltpu

# ----------------------------- model hyper-params (small) -----------------------------
N_BATCH = 2        # batch (events)
C_IN = 4           # input particle feature channels
P_PART = 8         # particles per event
EMBED_DIM = 32     # transformer width
NUM_HEADS = 2
HEAD_DIM = EMBED_DIM // NUM_HEADS
FFN_DIM = 64
PAIR_HID = 8       # hidden width of the pair-embedding 1x1-conv stack
NUM_CLASSES = 2
LN_EPS = 1e-5
NUM_PART_BLOCKS = 1
NUM_CLS_BLOCKS = 1
MAX_EVENTS_PER_TILE = 32   # events stacked along the sublane axis per grid step

_PART_PREFIXES = ["blk%d" % i for i in range(NUM_PART_BLOCKS)]
_CLS_PREFIXES = ["cls%d" % i for i in range(NUM_CLS_BLOCKS)]
_BLOCK_PREFIXES = _PART_PREFIXES + _CLS_PREFIXES

SLAB_LANES = 128   # both weight slabs are (rows, 128)


# ------------------------------ packed weight-slab layouts ------------------------------
def _w_entries():
    """(name, (rows, cols)) for the bf16 matmul-weight slab."""
    e = [("embed.w0", (C_IN, EMBED_DIM)),
         ("embed.w1", (EMBED_DIM, EMBED_DIM)),
         ("pair.w0_blk", (P_PART * C_IN, P_PART * PAIR_HID)),
         ("pair.w1_blk", (P_PART * PAIR_HID, NUM_HEADS * P_PART))]
    for pfx in _BLOCK_PREFIXES:
        e += [(pfx + ".wqkv", (EMBED_DIM, 3 * EMBED_DIM)),
              (pfx + ".wo", (EMBED_DIM, EMBED_DIM)),
              (pfx + ".w_fc1", (EMBED_DIM, FFN_DIM)),
              (pfx + ".w_fc2", (FFN_DIM, EMBED_DIM))]
    e.append(("fc_w", (EMBED_DIM, NUM_CLASSES)))
    return e


def _v_entries():
    """(name, cols) for the f32 LN/bias/vector slab (one row per param)."""
    e = [("embed.ln0_g", C_IN), ("embed.ln0_b", C_IN), ("embed.b0", EMBED_DIM),
         ("embed.ln1_g", EMBED_DIM), ("embed.ln1_b", EMBED_DIM), ("embed.b1", EMBED_DIM),
         ("pair.b0_tiled", P_PART * PAIR_HID), ("pair.b1_tiled", NUM_HEADS * P_PART)]
    for pfx in _BLOCK_PREFIXES:
        e += [(pfx + ".ln1_g", EMBED_DIM), (pfx + ".ln1_b", EMBED_DIM),
              (pfx + ".bqkv", 3 * EMBED_DIM), (pfx + ".bo", EMBED_DIM),
              (pfx + ".ln2_g", EMBED_DIM), (pfx + ".ln2_b", EMBED_DIM),
              (pfx + ".b_fc1", FFN_DIM), (pfx + ".b_fc2", EMBED_DIM)]
    e += [("cls_token", EMBED_DIM), ("final_ln_g", EMBED_DIM),
          ("final_ln_b", EMBED_DIM), ("fc_b", NUM_CLASSES)]
    return e


def _build_w_layout():
    layout, off = {}, 0
    for name, (r, c) in _w_entries():
        layout[name] = (off, r, c)
        off += -(-r // 8) * 8            # keep each weight's row offset 8-aligned
    return layout, off


def _build_v_layout():
    layout = {}
    for i, (name, c) in enumerate(_v_entries()):
        layout[name] = (i, c)
    rows = -(-len(layout) // 8) * 8
    return layout, rows


_W_LAYOUT, _W_ROWS = _build_w_layout()
_V_LAYOUT, _V_ROWS = _build_v_layout()


# ----------------------------------- fused Pallas kernel -----------------------------------
def _fused_kernel(feat_ref, pair_ref, maskc_ref, keyadd_ref, w_ref, v_ref,
                  emb_ref, logits_ref, *, b_tile):
    """One grid step == B_TILE events stacked along the sublane axis."""
    f32, bf16 = jnp.float32, jnp.bfloat16
    B, P, D, H, Dh = b_tile, P_PART, EMBED_DIM, NUM_HEADS, HEAD_DIM

    def W(name):                                 # bf16 matmul weight from the packed slab
        off, r, c = _W_LAYOUT[name]
        return w_ref[off:off + r, 0:c]

    def V(name):                                 # f32 (1, c) LN/bias vector
        row, c = _V_LAYOUT[name]
        return v_ref[row:row + 1, 0:c]

    def mxu(a, b):                               # bf16 operands, f32 accumulation
        return jnp.dot(a.astype(bf16), b, preferred_element_type=f32)

    def bdot(spec, a, b):                        # batched einsum on the MXU
        return jnp.einsum(spec, a.astype(bf16), b.astype(bf16),
                          preferred_element_type=f32)

    def ln(x, g, b):
        xf = x.astype(f32)
        mu = jnp.mean(xf, axis=-1, keepdims=True)
        xc = xf - mu
        var = jnp.mean(xc * xc, axis=-1, keepdims=True)
        return xc * jax.lax.rsqrt(var + LN_EPS) * V(g) + V(b)

    def gelu(y):
        # TODO(synk): tanh-approx GELU; PyTorch nn.GELU default is exact erf (~1e-3 deviation).
        return 0.5 * y * (1.0 + jnp.tanh(0.7978845608028654 * (y + 0.044715 * y * y * y)))

    mask_col = maskc_ref[0].astype(f32)          # (B*P, 1)  1 = valid particle
    key_add = keyadd_ref[0].astype(f32)          # (B, 1, P) 0 / -1e9 key-padding mask

    # ---------------- Embed MLP (LN -> Linear -> GELU, twice), full event tile at once ----------------
    # TODO(synk): input BatchNorm1d treated as identity (default running stats); trained BN stats
    # should be folded into embed.w0 / embed.b0 at pack time.
    x = feat_ref[0].astype(f32)                  # (B*P, C)
    x = ln(x, "embed.ln0_g", "embed.ln0_b")
    x = gelu(mxu(x, W("embed.w0")) + V("embed.b0"))
    x = ln(x, "embed.ln1_g", "embed.ln1_b")
    x = gelu(mxu(x, W("embed.w1")) + V("embed.b1"))
    x = x * mask_col                             # (B*P, D), padded particles zero-filled

    # ---------------- PairEmbed: two MXU dots on the flat pairwise-feature slab ----------------
    # pair_ref columns are (j*C + c); the block-diagonal-expanded weights (built at pack time)
    # keep the per-(i,j) 1x1-conv independent while using plain 2D matmuls.
    u = pair_ref[0].astype(f32)                                       # (B*P, P*C)
    hid = gelu(mxu(u, W("pair.w0_blk")) + V("pair.b0_tiled"))         # (B*P, P*PAIR_HID)
    bias_all = mxu(hid, W("pair.w1_blk")) + V("pair.b1_tiled")        # (B*P, H*P), col = h*P + j
    bias_heads = [bias_all[:, h * P:(h + 1) * P].reshape(B, P, P) + key_add
                  for h in range(H)]                                  # per-head (B, P, P)

    # ---------------- particle attention block(s) ----------------
    def particle_block(xt, pfx):
        h1 = ln(xt, pfx + ".ln1_g", pfx + ".ln1_b")                   # (B*P, D)
        qkv = mxu(h1, W(pfx + ".wqkv")) + V(pfx + ".bqkv")            # (B*P, 3D) fused QKV
        q3 = qkv[:, 0:D].reshape(B, P, D)       # attention scale folded into Q at pack time
        k3 = qkv[:, D:2 * D].reshape(B, P, D)
        v3 = qkv[:, 2 * D:3 * D].reshape(B, P, D)
        heads = []
        for h in range(H):                       # tiny (P,P) score math: 2 batched einsums / head
            sl = slice(h * Dh, (h + 1) * Dh)
            s = bdot("bqd,bkd->bqk", q3[..., sl], k3[..., sl]) + bias_heads[h]
            s = s - jnp.max(s, axis=-1, keepdims=True)
            e = jnp.exp(s)
            e = e * pl.reciprocal(jnp.sum(e, axis=-1, keepdims=True), approx=True)
            heads.append(bdot("bqk,bkd->bqd", e, v3[..., sl]))        # (B, P, Dh)
        o = jnp.concatenate(heads, axis=-1).reshape(B * P, D)
        xt = xt + mxu(o, W(pfx + ".wo")) + V(pfx + ".bo")             # one concat-heads out-proj
        h2 = ln(xt, pfx + ".ln2_g", pfx + ".ln2_b")
        ff = gelu(mxu(h2, W(pfx + ".w_fc1")) + V(pfx + ".b_fc1"))
        ff = mxu(ff, W(pfx + ".w_fc2")) + V(pfx + ".b_fc2")
        return xt + ff

    for pfx in _PART_PREFIXES:
        x = particle_block(x, pfx)

    # ---------------- class-attention block(s) ----------------
    def cls_block(cls_tok, xt, pfx):
        # keys/values = [cls ; particles], query = cls.  LN is row-wise, so the normalized concat
        # and the softmax over [cls-key ; particle-keys] are computed in split form.
        x_n = ln(xt, pfx + ".ln1_g", pfx + ".ln1_b")                  # (B*P, D)
        c_n = ln(cls_tok, pfx + ".ln1_g", pfx + ".ln1_b")             # (B, D)
        qkv_c = mxu(c_n, W(pfx + ".wqkv")) + V(pfx + ".bqkv")         # (B, 3D)
        kv_x = mxu(x_n, W(pfx + ".wqkv")) + V(pfx + ".bqkv")          # (B*P, 3D), K/V once per block
        q3 = qkv_c[:, 0:D].reshape(B, 1, D)
        kc3 = qkv_c[:, D:2 * D].reshape(B, 1, D)
        vc3 = qkv_c[:, 2 * D:3 * D].reshape(B, 1, D)
        kx3 = kv_x[:, D:2 * D].reshape(B, P, D)
        vx3 = kv_x[:, 2 * D:3 * D].reshape(B, P, D)
        heads = []
        for h in range(H):
            sl = slice(h * Dh, (h + 1) * Dh)
            qh, kch, vch = q3[..., sl], kc3[..., sl], vc3[..., sl]
            s_c = jnp.sum(qh * kch, axis=-1, keepdims=True)           # (B, 1, 1) cls key (unmasked)
            s_x = bdot("bqd,bkd->bqk", qh, kx3[..., sl]) + key_add    # (B, 1, P)
            m = jnp.maximum(jnp.max(s_x, axis=-1, keepdims=True), s_c)
            e_c = jnp.exp(s_c - m)
            e_x = jnp.exp(s_x - m)
            inv = pl.reciprocal(e_c + jnp.sum(e_x, axis=-1, keepdims=True), approx=True)
            heads.append((e_c * vch +
                          bdot("bqk,bkd->bqd", e_x, vx3[..., sl])) * inv)   # (B, 1, Dh)
        o = jnp.concatenate(heads, axis=-1).reshape(B, D)
        cls_tok = cls_tok + mxu(o, W(pfx + ".wo")) + V(pfx + ".bo")
        h2 = ln(cls_tok, pfx + ".ln2_g", pfx + ".ln2_b")
        ff = gelu(mxu(h2, W(pfx + ".w_fc1")) + V(pfx + ".b_fc1"))
        ff = mxu(ff, W(pfx + ".w_fc2")) + V(pfx + ".b_fc2")
        return cls_tok + ff

    cls = jnp.broadcast_to(V("cls_token"), (B, D)).astype(f32)        # (B, D)
    for pfx in _CLS_PREFIXES:
        cls = cls_block(cls, x, pfx)

    # ---------------- final LayerNorm + classifier head (one per-tile store each) ----------------
    out = ln(cls, "final_ln_g", "final_ln_b")                         # (B, D)
    emb_ref[0] = out.astype(emb_ref.dtype)
    logits = mxu(out, W("fc_w")) + V("fc_b")                          # (B, NUM_CLASSES)
    logits_ref[0] = logits.astype(logits_ref.dtype)


# ------------------------------ plain-JAX glue (feature prep) ------------------------------
def pairwise_lv_features(v, eps=1e-8):
    """Pairwise kinematic features (lndelta, lnkt, lnz, lnm2), (N, 4, P, P).

    # TODO(synk): arctan2/log kinematic prep stays in plain XLA (no Mosaic arctan2 lowering);
    # everything downstream runs inside the single fused Pallas kernel.
    """
    px, py, pz, e = v[:, 0], v[:, 1], v[:, 2], v[:, 3]
    pt = jnp.sqrt(px * px + py * py + eps)
    rap = 0.5 * jnp.log(jnp.maximum(e + pz, eps) / jnp.maximum(e - pz, eps))
    phi = jnp.arctan2(py, px)

    rap_i, rap_j = rap[:, :, None], rap[:, None, :]
    phi_i, phi_j = phi[:, :, None], phi[:, None, :]
    dphi = jnp.mod(phi_i - phi_j + jnp.pi, 2.0 * jnp.pi) - jnp.pi
    delta = jnp.sqrt(jnp.maximum((rap_i - rap_j) ** 2 + dphi * dphi, eps))
    lndelta = jnp.log(jnp.maximum(delta, eps))

    pti, ptj = pt[:, :, None], pt[:, None, :]
    ptmin = jnp.minimum(pti, ptj)
    lnkt = jnp.log(jnp.maximum(ptmin * delta, eps))
    lnz = jnp.log(jnp.maximum(ptmin / jnp.maximum(pti + ptj, eps), eps))

    eij = e[:, :, None] + e[:, None, :]
    pxij = px[:, :, None] + px[:, None, :]
    pyij = py[:, :, None] + py[:, None, :]
    pzij = pz[:, :, None] + pz[:, None, :]
    m2 = eij * eij - pxij * pxij - pyij * pyij - pzij * pzij
    lnm2 = jnp.log(jnp.maximum(m2, eps))

    return jnp.stack([lndelta, lnkt, lnz, lnm2], axis=1)              # (N, 4, P, P)


# ----------------------------------- fused forward wrapper -----------------------------------
@jax.jit
def _fused_forward(wslab, vslab, features, lorentz_vectors, mask):
    """features: (N, C, P), lorentz_vectors: (N, 4, P), mask: (N, 1, P)."""
    N = features.shape[0]
    P, C, D, NC = P_PART, C_IN, EMBED_DIM, NUM_CLASSES
    b_tile = math.gcd(N, MAX_EVENTS_PER_TILE)     # events per grid step (divides N)
    g = N // b_tile

    maskf = (mask > 0).astype(jnp.float32)
    mask_col = jnp.transpose(maskf, (0, 2, 1)).reshape(g, b_tile * P, 1)
    key_add = jnp.where(maskf > 0, 0.0, -1e9).reshape(g, b_tile, 1, P)
    feat = jnp.transpose(features, (0, 2, 1)).reshape(g, b_tile * P, C)
    pair_u = pairwise_lv_features(lorentz_vectors)                    # (N, 4, P, P)
    pair_u = jnp.transpose(pair_u, (0, 2, 3, 1)).reshape(g, b_tile * P, P * C)

    kernel = functools.partial(_fused_kernel, b_tile=b_tile)

    # NOTE: weight-slab blocks have a constant block index; pipeline_mode=pl.Buffered(1) could
    # drop their second buffer, but VMEM headroom is huge here so the default is kept.
    emb3, logits3 = pl.pallas_call(
        kernel,
        out_shape=(jax.ShapeDtypeStruct((g, b_tile, D), jnp.float32),
                   jax.ShapeDtypeStruct((g, b_tile, NC), jnp.float32)),
        grid=(g,),
        in_specs=[
            pl.BlockSpec((1, b_tile * P, C), lambda i: (i, 0, 0)),
            pl.BlockSpec((1, b_tile * P, P * C), lambda i: (i, 0, 0)),
            pl.BlockSpec((1, b_tile * P, 1), lambda i: (i, 0, 0)),
            pl.BlockSpec((1, b_tile, 1, P), lambda i: (i, 0, 0, 0)),
            pl.BlockSpec((_W_ROWS, SLAB_LANES), lambda i: (0, 0)),    # resident bf16 weight slab
            pl.BlockSpec((_V_ROWS, SLAB_LANES), lambda i: (0, 0)),    # resident f32 vector slab
        ],
        out_specs=(pl.BlockSpec((1, b_tile, D), lambda i: (i, 0, 0)),
                   pl.BlockSpec((1, b_tile, NC), lambda i: (i, 0, 0))),
        # TODO(synk): on v7x, switch this axis to pltpu.CORE_PARALLEL (or pl.core_map over a
        # tensorcore mesh) so event tiles are sharded across the 2 TensorCores.
        compiler_params=pltpu.CompilerParams(dimension_semantics=("parallel",)),
    )(feat, pair_u, mask_col, key_add, wslab, vslab)

    return emb3.reshape(N, D), logits3.reshape(N, NC)


def pm_transformer_embedder_forward(packed, features, lorentz_vectors, mask, embed=False):
    wslab, vslab = packed
    emb, logits = _fused_forward(wslab, vslab, features, lorentz_vectors, mask)
    return emb if embed else logits


def pm_transformer_embedder_wrapper_forward(packed, points, features, lorentz_vectors,
                                            mask, embed=False):
    # Mirrors PMTransformerEmbedderWrapper.forward: `points` is ignored.
    del points
    return pm_transformer_embedder_forward(packed, features, lorentz_vectors, mask, embed=embed)


# --------------------------------- deterministic init + packing ---------------------------------
class _KeyGen:
    def __init__(self, key):
        self._key = key

    def __call__(self):
        self._key, sub = jax.random.split(self._key)
        return sub


def init_params(key):
    """Raw (PyTorch-layout-ish) parameter dict."""
    kg = _KeyGen(key)
    D = EMBED_DIM

    def dense(din, dout):
        w = jax.random.normal(kg(), (din, dout), jnp.float32) * 0.02
        b = jnp.zeros((1, dout), jnp.float32)
        return w, b

    def lnp(d):
        return jnp.ones((1, d), jnp.float32), jnp.zeros((1, d), jnp.float32)

    p = {}
    p["embed.ln0_g"], p["embed.ln0_b"] = lnp(C_IN)
    p["embed.w0"], p["embed.b0"] = dense(C_IN, D)
    p["embed.ln1_g"], p["embed.ln1_b"] = lnp(D)
    p["embed.w1"], p["embed.b1"] = dense(D, D)
    p["pair.w0"], p["pair.b0"] = dense(C_IN, PAIR_HID)
    p["pair.w1"], p["pair.b1"] = dense(PAIR_HID, NUM_HEADS)
    for pfx in _BLOCK_PREFIXES:
        p[pfx + ".ln1_g"], p[pfx + ".ln1_b"] = lnp(D)
        p[pfx + ".wq"], p[pfx + ".bq"] = dense(D, D)
        p[pfx + ".wk"], p[pfx + ".bk"] = dense(D, D)
        p[pfx + ".wv"], p[pfx + ".bv"] = dense(D, D)
        p[pfx + ".wo"], p[pfx + ".bo"] = dense(D, D)
        p[pfx + ".ln2_g"], p[pfx + ".ln2_b"] = lnp(D)
        p[pfx + ".w_fc1"], p[pfx + ".b_fc1"] = dense(D, FFN_DIM)
        p[pfx + ".w_fc2"], p[pfx + ".b_fc2"] = dense(FFN_DIM, D)
    p["cls_token"] = jax.random.normal(kg(), (1, D), jnp.float32) * 0.02
    p["final_ln_g"], p["final_ln_b"] = lnp(D)
    p["fc_w"], p["fc_b"] = dense(D, NUM_CLASSES)
    return p


def pack_params(p):
    """Fold + pack raw params into (bf16 matmul-weight slab, f32 vector slab)."""
    f32 = jnp.float32
    scale = 1.0 / math.sqrt(HEAD_DIM)
    eye_p = jnp.eye(P_PART, dtype=f32)

    wvals = {
        "embed.w0": p["embed.w0"],
        "embed.w1": p["embed.w1"],
        # block-diagonal expansion of the pair-embed 1x1 convs so the kernel can use plain 2D dots
        "pair.w0_blk": jnp.kron(eye_p, p["pair.w0"]),                                 # (P*C, P*HID)
        "pair.w1_blk": jnp.concatenate(
            [jnp.kron(eye_p, p["pair.w1"][:, h:h + 1]) for h in range(NUM_HEADS)],
            axis=1),                                                                  # (P*HID, H*P)
        "fc_w": p["fc_w"],
    }
    vvals = {
        "embed.ln0_g": p["embed.ln0_g"], "embed.ln0_b": p["embed.ln0_b"],
        "embed.b0": p["embed.b0"],
        "embed.ln1_g": p["embed.ln1_g"], "embed.ln1_b": p["embed.ln1_b"],
        "embed.b1": p["embed.b1"],
        "pair.b0_tiled": jnp.tile(p["pair.b0"], (1, P_PART)),
        "pair.b1_tiled": jnp.repeat(p["pair.b1"], P_PART, axis=1),
        "cls_token": p["cls_token"],
        "final_ln_g": p["final_ln_g"], "final_ln_b": p["final_ln_b"],
        "fc_b": p["fc_b"],
    }
    for pfx in _BLOCK_PREFIXES:
        # fused QKV with the attention scale 1/sqrt(Dh) folded into the Q columns/bias
        wvals[pfx + ".wqkv"] = jnp.concatenate(
            [p[pfx + ".wq"] * scale, p[pfx + ".wk"], p[pfx + ".wv"]], axis=1)
        vvals[pfx + ".bqkv"] = jnp.concatenate(
            [p[pfx + ".bq"] * scale, p[pfx + ".bk"], p[pfx + ".bv"]], axis=1)
        wvals[pfx + ".wo"] = p[pfx + ".wo"]
        vvals[pfx + ".bo"] = p[pfx + ".bo"]
        wvals[pfx + ".w_fc1"] = p[pfx + ".w_fc1"]
        vvals[pfx + ".b_fc1"] = p[pfx + ".b_fc1"]
        wvals[pfx + ".w_fc2"] = p[pfx + ".w_fc2"]
        vvals[pfx + ".b_fc2"] = p[pfx + ".b_fc2"]
        for nm in (".ln1_g", ".ln1_b", ".ln2_g", ".ln2_b"):
            vvals[pfx + nm] = p[pfx + nm]

    wslab = jnp.zeros((_W_ROWS, SLAB_LANES), f32)
    for name, (off, r, c) in _W_LAYOUT.items():
        wslab = wslab.at[off:off + r, 0:c].set(wvals[name].astype(f32))
    vslab = jnp.zeros((_V_ROWS, SLAB_LANES), f32)
    for name, (row, c) in _V_LAYOUT.items():
        vslab = vslab.at[row, 0:c].set(vvals[name].reshape(-1).astype(f32))
    # MXU operands in bf16 (f32 accumulation); LN/bias vectors stay f32 for the VPU/EUP.
    return wslab.astype(jnp.bfloat16), vslab


# ---------------------------------------- main ----------------------------------------
if __name__ == "__main__":
    key = jax.random.PRNGKey(0)
    k_pts, k_feat, k_p3 = jax.random.split(key, 3)

    N, C, P = N_BATCH, C_IN, P_PART
    points = jax.random.normal(k_pts, (N, 2, P), jnp.float32)            # (eta, phi); unused
    features = jax.random.normal(k_feat, (N, C, P), jnp.float32)         # (N, C, P)
    p3 = jax.random.normal(k_p3, (N, 3, P), jnp.float32)
    energy = jnp.sqrt(jnp.sum(p3 * p3, axis=1, keepdims=True) + 0.1)
    lorentz_vectors = jnp.concatenate([p3, energy], axis=1)              # (N, 4, P): px,py,pz,E
    valid = jnp.arange(P)[None, :] < jnp.array([5, P])[:, None]
    mask = valid.astype(jnp.float32)[:, None, :]                         # (N, 1, P)

    raw_params = init_params(jax.random.PRNGKey(42))
    packed = pack_params(raw_params)

    logits = pm_transformer_embedder_wrapper_forward(
        packed, points, features, lorentz_vectors, mask, embed=False)
    logits = jax.block_until_ready(logits)
    emb = pm_transformer_embedder_wrapper_forward(
        packed, points, features, lorentz_vectors, mask, embed=True)
    emb = jax.block_until_ready(emb)

    assert logits.shape == (N, NUM_CLASSES), logits.shape
    assert emb.shape == (N, EMBED_DIM), emb.shape
    assert bool(jnp.all(jnp.isfinite(logits))) and bool(jnp.all(jnp.isfinite(emb)))
    print("KERNEL_OK")
</pallas_src>

<mosaic_0001>
module attributes {stable_mosaic.version = 11 : i64} {
  func.func @_fused_kernel(%arg0: i32, %arg1: memref<1x16x4xf32, #tpu.memory_space<vmem>>, %arg2: memref<1x16x32xf32, #tpu.memory_space<vmem>>, %arg3: memref<1x16x1xf32, #tpu.memory_space<vmem>>, %arg4: memref<1x2x1x8xf32, #tpu.memory_space<vmem>>, %arg5: memref<488x128xbf16, #tpu.memory_space<vmem>>, %arg6: memref<32x128xf32, #tpu.memory_space<vmem>>, %arg7: memref<1x2x32xf32, #tpu.memory_space<vmem>>, %arg8: memref<1x2x2xf32, #tpu.memory_space<vmem>>) attributes {dimension_semantics = [#tpu.dimension_semantics<parallel>], iteration_bounds = array<i64: 1>, scalar_prefetch = 0 : i64, scratch_operands = 0 : i64, tpu.core_type = #tpu.core_type<tc>, window_params = [{transform_indices = @transform_0, window_bounds = array<i64: 1, 16, 4>}, {transform_indices = @transform_1, window_bounds = array<i64: 1, 16, 32>}, {transform_indices = @transform_2, window_bounds = array<i64: 1, 16, 1>}, {transform_indices = @transform_3, window_bounds = array<i64: 1, 2, 1, 8>}, {pipeline_mode = #tpu.pipeline_mode<synchronous>, transform_indices = @transform_4, window_bounds = array<i64: 488, 128>}, {pipeline_mode = #tpu.pipeline_mode<synchronous>, transform_indices = @transform_5, window_bounds = array<i64: 32, 128>}, {transform_indices = @transform_6, window_bounds = array<i64: 1, 2, 32>}, {transform_indices = @transform_7, window_bounds = array<i64: 1, 2, 2>}]} {
    %c0 = arith.constant 0 : index
    %c0_0 = arith.constant 0 : index
    %c0_1 = arith.constant 0 : index
    %0 = vector.load %arg3[%c0, %c0_0, %c0_1] : memref<1x16x1xf32, #tpu.memory_space<vmem>>, vector<1x16x1xf32>
    %1 = vector.shape_cast %0 : vector<1x16x1xf32> to vector<16x1xf32>
    %c0_2 = arith.constant 0 : index
    %c0_3 = arith.constant 0 : index
    %c0_4 = arith.constant 0 : index
    %c0_5 = arith.constant 0 : index
    %2 = vector.load %arg4[%c0_2, %c0_3, %c0_4, %c0_5] : memref<1x2x1x8xf32, #tpu.memory_space<vmem>>, vector<1x2x1x8xf32>
    %3 = vector.shape_cast %2 : vector<1x2x1x8xf32> to vector<2x1x8xf32>
    %c0_6 = arith.constant 0 : index
    %c0_7 = arith.constant 0 : index
    %c0_8 = arith.constant 0 : index
    %4 = vector.load %arg1[%c0_6, %c0_7, %c0_8] : memref<1x16x4xf32, #tpu.memory_space<vmem>>, vector<1x16x4xf32>
    %5 = vector.shape_cast %4 : vector<1x16x4xf32> to vector<16x4xf32>
    %cst = arith.constant dense<0.000000e+00> : vector<16xf32>
    %6 = vector.multi_reduction <add>, %5, %cst [1] : vector<16x4xf32> to vector<16xf32>
    %7 = vector.shape_cast %6 : vector<16xf32> to vector<16x1xf32>
    %cst_9 = arith.constant 4.000000e+00 : f32
    %8 = vector.broadcast %cst_9 : f32 to vector<16x1xf32>
    %9 = arith.divf %7, %8 : vector<16x1xf32>
    %10 = vector.broadcast %9 : vector<16x1xf32> to vector<16x4xf32>
    %11 = arith.subf %5, %10 : vector<16x4xf32>
    %12 = arith.mulf %11, %11 : vector<16x4xf32>
    %cst_10 = arith.constant dense<0.000000e+00> : vector<16xf32>
    %13 = vector.multi_reduction <add>, %12, %cst_10 [1] : vector<16x4xf32> to vector<16xf32>
    %14 = vector.shape_cast %13 : vector<16xf32> to vector<16x1xf32>
    %cst_11 = arith.constant 4.000000e+00 : f32
    %15 = vector.broadcast %cst_11 : f32 to vector<16x1xf32>
    %16 = arith.divf %14, %15 : vector<16x1xf32>
    %cst_12 = arith.constant 9.99999974E-6 : f32
    %17 = vector.broadcast %cst_12 : f32 to vector<16x1xf32>
    %18 = arith.addf %16, %17 : vector<16x1xf32>
    %19 = math.rsqrt %18 : vector<16x1xf32>
    %20 = vector.broadcast %19 : vector<16x1xf32> to vector<16x4xf32>
    %21 = arith.mulf %11, %20 : vector<16x4xf32>
    %c0_13 = arith.constant 0 : index
    %c0_14 = arith.constant 0 : index
    %22 = vector.load %arg6[%c0_13, %c0_14] : memref<32x128xf32, #tpu.memory_space<vmem>>, vector<1x4xf32>
    %23 = vector.broadcast %22 : vector<1x4xf32> to vector<16x4xf32>
    %24 = arith.mulf %21, %23 : vector<16x4xf32>
    %c1 = arith.constant 1 : index
    %c0_15 = arith.constant 0 : index
    %25 = vector.load %arg6[%c1, %c0_15] : memref<32x128xf32, #tpu.memory_space<vmem>>, vector<1x4xf32>
    %26 = vector.broadcast %25 : vector<1x4xf32> to vector<16x4xf32>
    %27 = arith.addf %24, %26 : vector<16x4xf32>
    %c0_16 = arith.constant 0 : index
    %c0_17 = arith.constant 0 : index
    %28 = vector.load %arg5[%c0_16, %c0_17] : memref<488x128xbf16, #tpu.memory_space<vmem>>, vector<4x32xbf16>
    %29 = arith.truncf %27 : vector<16x4xf32> to vector<16x4xbf16>
    %cst_18 = arith.constant dense<0.000000e+00> : vector<16x32xf32>
    %30 = tpu.matmul %29, %28, %cst_18 {dimension_numbers = #tpu.dot_dimension_numbers<[1], [0], [0], [1], [0, 0, 1, 1], [], []>} : vector<16x4xbf16>, vector<4x32xbf16>, vector<16x32xf32> -> vector<16x32xf32>
    %c2 = arith.constant 2 : index
    %c0_19 = arith.constant 0 : index
    %31 = vector.load %arg6[%c2, %c0_19] : memref<32x128xf32, #tpu.memory_space<vmem>>, vector<1x32xf32>
    %32 = vector.broadcast %31 : vector<1x32xf32> to vector<16x32xf32>
    %33 = arith.addf %30, %32 : vector<16x32xf32>
    %cst_20 = arith.constant 5.000000e-01 : f32
    %34 = vector.broadcast %cst_20 : f32 to vector<16x32xf32>
    %35 = arith.mulf %34, %33 : vector<16x32xf32>
    %cst_21 = arith.constant 4.471500e-02 : f32
    %36 = vector.broadcast %cst_21 : f32 to vector<16x32xf32>
    %37 = arith.mulf %36, %33 : vector<16x32xf32>
    %38 = arith.mulf %37, %33 : vector<16x32xf32>
    %39 = arith.mulf %38, %33 : vector<16x32xf32>
    %40 = arith.addf %33, %39 : vector<16x32xf32>
    %cst_22 = arith.constant 0.797884583 : f32
    %41 = vector.broadcast %cst_22 : f32 to vector<16x32xf32>
    %42 = arith.mulf %41, %40 : vector<16x32xf32>
    %43 = math.tanh %42 : vector<16x32xf32>
    %cst_23 = arith.constant 1.000000e+00 : f32
    %44 = vector.broadcast %cst_23 : f32 to vector<16x32xf32>
    %45 = arith.addf %44, %43 : vector<16x32xf32>
    %46 = arith.mulf %35, %45 : vector<16x32xf32>
    %cst_24 = arith.constant dense<0.000000e+00> : vector<16xf32>
    %47 = vector.multi_reduction <add>, %46, %cst_24 [1] : vector<16x32xf32> to vector<16xf32>
    %48 = vector.shape_cast %47 : vector<16xf32> to vector<16x1xf32>
    %cst_25 = arith.constant 3.200000e+01 : f32
    %49 = vector.broadcast %cst_25 : f32 to vector<16x1xf32>
    %50 = arith.divf %48, %49 : vector<16x1xf32>
    %51 = vector.broadcast %50 : vector<16x1xf32> to vector<16x32xf32>
    %52 = arith.subf %46, %51 : vector<16x32xf32>
    %53 = arith.mulf %52, %52 : vector<16x32xf32>
    %cst_26 = arith.constant dense<0.000000e+00> : vector<16xf32>
    %54 = vector.multi_reduction <add>, %53, %cst_26 [1] : vector<16x32xf32> to vector<16xf32>
    %55 = vector.shape_cast %54 : vector<16xf32> to vector<16x1xf32>
    %cst_27 = arith.constant 3.200000e+01 : f32
    %56 = vector.broadcast %cst_27 : f32 to vector<16x1xf32>
    %57 = arith.divf %55, %56 : vector<16x1xf32>
    %cst_28 = arith.constant 9.99999974E-6 : f32
    %58 = vector.broadcast %cst_28 : f32 to vector<16x1xf32>
    %59 = arith.addf %57, %58 : vector<16x1xf32>
    %60 = math.rsqrt %59 : vector<16x1xf32>
    %61 = vector.broadcast %60 : vector<16x1xf32> to vector<16x32xf32>
    %62 = arith.mulf %52, %61 : vector<16x32xf32>
    %c3 = arith.constant 3 : index
    %c0_29 = arith.constant 0 : index
    %63 = vector.load %arg6[%c3, %c0_29] : memref<32x128xf32, #tpu.memory_space<vmem>>, vector<1x32xf32>
    %64 = vector.broadcast %63 : vector<1x32xf32> to vector<16x32xf32>
    %65 = arith.mulf %62, %64 : vector<16x32xf32>
    %c4 = arith.constant 4 : index
    %c0_30 = arith.constant 0 : index
    %66 = vector.load %arg6[%c4, %c0_30] : memref<32x128xf32, #tpu.memory_space<vmem>>, vector<1x32xf32>
    %67 = vector.broadcast %66 : vector<1x32xf32> to vector<16x32xf32>
    %68 = arith.addf %65, %67 : vector<16x32xf32>
    %c8 = arith.constant 8 : index
    %c0_31 = arith.constant 0 : index
    %69 = vector.load %arg5[%c8, %c0_31] : memref<488x128xbf16, #tpu.memory_space<vmem>>, vector<32x32xbf16>
    %70 = arith.truncf %68 : vector<16x32xf32> to vector<16x32xbf16>
    %cst_32 = arith.constant dense<0.000000e+00> : vector<16x32xf32>
    %71 = tpu.matmul %70, %69, %cst_32 {dimension_numbers = #tpu.dot_dimension_numbers<[1], [0], [0], [1], [0, 0, 1, 1], [], []>} : vector<16x32xbf16>, vector<32x32xbf16>, vector<16x32xf32> -> vector<16x32xf32>
    %c5 = arith.constant 5 : index
    %c0_33 = arith.constant 0 : index
    %72 = vector.load %arg6[%c5, %c0_33] : memref<32x128xf32, #tpu.memory_space<vmem>>, vector<1x32xf32>
    %73 = vector.broadcast %72 : vector<1x32xf32> to vector<16x32xf32>
    %74 = arith.addf %71, %73 : vector<16x32xf32>
    %cst_34 = arith.constant 5.000000e-01 : f32
    %75 = vector.broadcast %cst_34 : f32 to vector<16x32xf32>
    %76 = arith.mulf %75, %74 : vector<16x32xf32>
    %cst_35 = arith.constant 4.471500e-02 : f32
    %77 = vector.broadcast %cst_35 : f32 to vector<16x32xf32>
    %78 = arith.mulf %77, %74 : vector<16x32xf32>
    %79 = arith.mulf %78, %74 : vector<16x32xf32>
    %80 = arith.mulf %79, %74 : vector<16x32xf32>
    %81 = arith.addf %74, %80 : vector<16x32xf32>
    %cst_36 = arith.constant 0.797884583 : f32
    %82 = vector.broadcast %cst_36 : f32 to vector<16x32xf32>
    %83 = arith.mulf %82, %81 : vector<16x32xf32>
    %84 = math.tanh %83 : vector<16x32xf32>
    %cst_37 = arith.constant 1.000000e+00 : f32
    %85 = vector.broadcast %cst_37 : f32 to vector<16x32xf32>
    %86 = arith.addf %85, %84 : vector<16x32xf32>
    %87 = arith.mulf %76, %86 : vector<16x32xf32>
    %88 = vector.broadcast %1 : vector<16x1xf32> to vector<16x32xf32>
    %89 = arith.mulf %87, %88 : vector<16x32xf32>
    %c0_38 = arith.constant 0 : index
    %c0_39 = arith.constant 0 : index
    %c0_40 = arith.constant 0 : index
    %90 = vector.load %arg2[%c0_38, %c0_39, %c0_40] : memref<1x16x32xf32, #tpu.memory_space<vmem>>, vector<1x16x32xf32>
    %91 = vector.shape_cast %90 : vector<1x16x32xf32> to vector<16x32xf32>
    %c40 = arith.constant 40 : index
    %c0_41 = arith.constant 0 : index
    %92 = vector.load %arg5[%c40, %c0_41] : memref<488x128xbf16, #tpu.memory_space<vmem>>, vector<32x64xbf16>
    %93 = arith.truncf %91 : vector<16x32xf32> to vector<16x32xbf16>
    %cst_42 = arith.constant dense<0.000000e+00> : vector<16x64xf32>
    %94 = tpu.matmul %93, %92, %cst_42 {dimension_numbers = #tpu.dot_dimension_numbers<[1], [0], [0], [1], [0, 0, 1, 1], [], []>} : vector<16x32xbf16>, vector<32x64xbf16>, vector<16x64xf32> -> vector<16x64xf32>
    %c6 = arith.constant 6 : index
    %c0_43 = arith.constant 0 : index
    %95 = vector.load %arg6[%c6, %c0_43] : memref<32x128xf32, #tpu.memory_space<vmem>>, vector<1x64xf32>
    %96 = vector.broadcast %95 : vector<1x64xf32> to vector<16x64xf32>
    %97 = arith.addf %94, %96 : vector<16x64xf32>
    %cst_44 = arith.constant 5.000000e-01 : f32
    %98 = vector.broadcast %cst_44 : f32 to vector<16x64xf32>
    %99 = arith.mulf %98, %97 : vector<16x64xf32>
    %cst_45 = arith.constant 4.471500e-02 : f32
    %100 = vector.broadcast %cst_45 : f32 to vector<16x64xf32>
    %101 = arith.mulf %100, %97 : vector<16x64xf32>
    %102 = arith.mulf %101, %97 : vector<16x64xf32>
    %103 = arith.mulf %102, %97 : vector<16x64xf32>
    %104 = arith.addf %97, %103 : vector<16x64xf32>
    %cst_46 = arith.constant 0.797884583 : f32
    %105 = vector.broadcast %cst_46 : f32 to vector<16x64xf32>
    %106 = arith.mulf %105, %104 : vector<16x64xf32>
    %107 = math.tanh %106 : vector<16x64xf32>
    %cst_47 = arith.constant 1.000000e+00 : f32
    %108 = vector.broadcast %cst_47 : f32 to vector<16x64xf32>
    %109 = arith.addf %108, %107 : vector<16x64xf32>
    %110 = arith.mulf %99, %109 : vector<16x64xf32>
    %c72 = arith.constant 72 : index
    %c0_48 = arith.constant 0 : index
    %111 = vector.load %arg5[%c72, %c0_48] : memref<488x128xbf16, #tpu.memory_space<vmem>>, vector<64x16xbf16>
    %112 = arith.truncf %110 : vector<16x64xf32> to vector<16x64xbf16>
    %cst_49 = arith.constant dense<0.000000e+00> : vector<16x16xf32>
    %113 = tpu.matmul %112, %111, %cst_49 {dimension_numbers = #tpu.dot_dimension_numbers<[1], [0], [0], [1], [0, 0, 1, 1], [], []>} : vector<16x64xbf16>, vector<64x16xbf16>, vector<16x16xf32> -> vector<16x16xf32>
    %c7 = arith.constant 7 : index
    %c0_50 = arith.constant 0 : index
    %114 = vector.load %arg6[%c7, %c0_50] : memref<32x128xf32, #tpu.memory_space<vmem>>, vector<1x16xf32>
    %115 = vector.broadcast %114 : vector<1x16xf32> to vector<16x16xf32>
    %116 = arith.addf %113, %115 : vector<16x16xf32>
    %117 = vector.extract_strided_slice %116 {offsets = [0, 0], sizes = [16, 8], strides = [1, 1]} : vector<16x16xf32> to vector<16x8xf32>
    %118 = vector.shape_cast %117 : vector<16x8xf32> to vector<2x8x8xf32>
    %119 = vector.broadcast %3 : vector<2x1x8xf32> to vector<2x8x8xf32>
    %120 = arith.addf %118, %119 : vector<2x8x8xf32>
    %121 = vector.extract_strided_slice %116 {offsets = [0, 8], sizes = [16, 8], strides = [1, 1]} : vector<16x16xf32> to vector<16x8xf32>
    %122 = vector.shape_cast %121 : vector<16x8xf32> to vector<2x8x8xf32>
    %123 = vector.broadcast %3 : vector<2x1x8xf32> to vector<2x8x8xf32>
    %124 = arith.addf %122, %123 : vector<2x8x8xf32>
    %cst_51 = arith.constant dense<0.000000e+00> : vector<16xf32>
    %125 = vector.multi_reduction <add>, %89, %cst_51 [1] : vector<16x32xf32> to vector<16xf32>
    %126 = vector.shape_cast %125 : vector<16xf32> to vector<16x1xf32>
    %cst_52 = arith.constant 3.200000e+01 : f32
    %127 = vector.broadcast %cst_52 : f32 to vector<16x1xf32>
    %128 = arith.divf %126, %127 : vector<16x1xf32>
    %129 = vector.broadcast %128 : vector<16x1xf32> to vector<16x32xf32>
    %130 = arith.subf %89, %129 : vector<16x32xf32>
    %131 = arith.mulf %130, %130 : vector<16x32xf32>
    %cst_53 = arith.constant dense<0.000000e+00> : vector<16xf32>
    %132 = vector.multi_reduction <add>, %131, %cst_53 [1] : vector<16x32xf32> to vector<16xf32>
    %133 = vector.shape_cast %132 : vector<16xf32> to vector<16x1xf32>
    %cst_54 = arith.constant 3.200000e+01 : f32
    %134 = vector.broadcast %cst_54 : f32 to vector<16x1xf32>
    %135 = arith.divf %133, %134 : vector<16x1xf32>
    %cst_55 = arith.constant 9.99999974E-6 : f32
    %136 = vector.broadcast %cst_55 : f32 to vector<16x1xf32>
    %137 = arith.addf %135, %136 : vector<16x1xf32>
    %138 = math.rsqrt %137 : vector<16x1xf32>
    %139 = vector.broadcast %138 : vector<16x1xf32> to vector<16x32xf32>
    %140 = arith.mulf %130, %139 : vector<16x32xf32>
    %c8_56 = arith.constant 8 : index
    %c0_57 = arith.constant 0 : index
    %141 = vector.load %arg6[%c8_56, %c0_57] : memref<32x128xf32, #tpu.memory_space<vmem>>, vector<1x32xf32>
    %142 = vector.broadcast %141 : vector<1x32xf32> to vector<16x32xf32>
    %143 = arith.mulf %140, %142 : vector<16x32xf32>
    %c9 = arith.constant 9 : index
    %c0_58 = arith.constant 0 : index
    %144 = vector.load %arg6[%c9, %c0_58] : memref<32x128xf32, #tpu.memory_space<vmem>>, vector<1x32xf32>
    %145 = vector.broadcast %144 : vector<1x32xf32> to vector<16x32xf32>
    %146 = arith.addf %143, %145 : vector<16x32xf32>
    %c136 = arith.constant 136 : index
    %c0_59 = arith.constant 0 : index
    %147 = vector.load %arg5[%c136, %c0_59] : memref<488x128xbf16, #tpu.memory_space<vmem>>, vector<32x96xbf16>
    %148 = arith.truncf %146 : vector<16x32xf32> to vector<16x32xbf16>
    %cst_60 = arith.constant dense<0.000000e+00> : vector<16x96xf32>
    %149 = tpu.matmul %148, %147, %cst_60 {dimension_numbers = #tpu.dot_dimension_numbers<[1], [0], [0], [1], [0, 0, 1, 1], [], []>} : vector<16x32xbf16>, vector<32x96xbf16>, vector<16x96xf32> -> vector<16x96xf32>
    %c10 = arith.constant 10 : index
    %c0_61 = arith.constant 0 : index
    %150 = vector.load %arg6[%c10, %c0_61] : memref<32x128xf32, #tpu.memory_space<vmem>>, vector<1x96xf32>
    %151 = vector.broadcast %150 : vector<1x96xf32> to vector<16x96xf32>
    %152 = arith.addf %149, %151 : vector<16x96xf32>
    %153 = vector.extract_strided_slice %152 {offsets = [0, 0], sizes = [16, 32], strides = [1, 1]} : vector<16x96xf32> to vector<16x32xf32>
    %154 = vector.shape_cast %153 : vector<16x32xf32> to vector<2x8x32xf32>
    %155 = vector.extract_strided_slice %152 {offsets = [0, 32], sizes = [16, 32], strides = [1, 1]} : vector<16x96xf32> to vector<16x32xf32>
    %156 = vector.shape_cast %155 : vector<16x32xf32> to vector<2x8x32xf32>
    %157 = vector.extract_strided_slice %152 {offsets = [0, 64], sizes = [16, 32], strides = [1, 1]} : vector<16x96xf32> to vector<16x32xf32>
    %158 = vector.shape_cast %157 : vector<16x32xf32> to vector<2x8x32xf32>
    %159 = vector.extract_strided_slice %154 {offsets = [0, 0, 0], sizes = [2, 8, 16], strides = [1, 1, 1]} : vector<2x8x32xf32> to vector<2x8x16xf32>
    %160 = vector.extract_strided_slice %156 {offsets = [0, 0, 0], sizes = [2, 8, 16], strides = [1, 1, 1]} : vector<2x8x32xf32> to vector<2x8x16xf32>
    %161 = arith.truncf %159 : vector<2x8x16xf32> to vector<2x8x16xbf16>
    %162 = arith.truncf %160 : vector<2x8x16xf32> to vector<2x8x16xbf16>
    "tpu.trace_start"() <{level = 10 : i32, message = "bqd,bkd->bqk"}> : () -> ()
    %cst_62 = arith.constant dense<0.000000e+00> : vector<2x8x8xf32>
    %163 = tpu.matmul %161, %162, %cst_62 {dimension_numbers = #tpu.dot_dimension_numbers<[2], [2], [1], [1], [0, 0, 0, 1, 1, 1], [0], [0]>} : vector<2x8x16xbf16>, vector<2x8x16xbf16>, vector<2x8x8xf32> -> vector<2x8x8xf32>
    "tpu.trace_stop"() : () -> ()
    %164 = arith.addf %163, %120 : vector<2x8x8xf32>
    %cst_63 = arith.constant dense<0xFF800000> : vector<2x8xf32>
    %165 = vector.multi_reduction <maximumf>, %164, %cst_63 [2] : vector<2x8x8xf32> to vector<2x8xf32>
    %166 = vector.shape_cast %165 : vector<2x8xf32> to vector<2x8x1xf32>
    %167 = vector.broadcast %166 : vector<2x8x1xf32> to vector<2x8x8xf32>
    %168 = arith.subf %164, %167 : vector<2x8x8xf32>
    %169 = math.exp %168 : vector<2x8x8xf32>
    %cst_64 = arith.constant dense<0.000000e+00> : vector<2x8xf32>
    %170 = vector.multi_reduction <add>, %169, %cst_64 [2] : vector<2x8x8xf32> to vector<2x8xf32>
    %171 = vector.shape_cast %170 : vector<2x8xf32> to vector<2x8x1xf32>
    %172 = tpu.reciprocal %171 {approx = true} : vector<2x8x1xf32> -> vector<2x8x1xf32>
    %173 = vector.broadcast %172 : vector<2x8x1xf32> to vector<2x8x8xf32>
    %174 = arith.mulf %169, %173 : vector<2x8x8xf32>
    %175 = vector.extract_strided_slice %158 {offsets = [0, 0, 0], sizes = [2, 8, 16], strides = [1, 1, 1]} : vector<2x8x32xf32> to vector<2x8x16xf32>
    %176 = arith.truncf %174 : vector<2x8x8xf32> to vector<2x8x8xbf16>
    %177 = arith.truncf %175 : vector<2x8x16xf32> to vector<2x8x16xbf16>
    "tpu.trace_start"() <{level = 10 : i32, message = "bqk,bkd->bqd"}> : () -> ()
    %cst_65 = arith.constant dense<0.000000e+00> : vector<2x8x16xf32>
    %178 = tpu.matmul %176, %177, %cst_65 {dimension_numbers = #tpu.dot_dimension_numbers<[2], [1], [1], [2], [0, 0, 0, 1, 1, 2], [0], [0]>} : vector<2x8x8xbf16>, vector<2x8x16xbf16>, vector<2x8x16xf32> -> vector<2x8x16xf32>
    "tpu.trace_stop"() : () -> ()
    %179 = vector.extract_strided_slice %154 {offsets = [0, 0, 16], sizes = [2, 8, 16], strides = [1, 1, 1]} : vector<2x8x32xf32> to vector<2x8x16xf32>
    %180 = vector.extract_strided_slice %156 {offsets = [0, 0, 16], sizes = [2, 8, 16], strides = [1, 1, 1]} : vector<2x8x32xf32> to vector<2x8x16xf32>
    %181 = arith.truncf %179 : vector<2x8x16xf32> to vector<2x8x16xbf16>
    %182 = arith.truncf %180 : vector<2x8x16xf32> to vector<2x8x16xbf16>
    "tpu.trace_start"() <{level = 10 : i32, message = "bqd,bkd->bqk"}> : () -> ()
    %cst_66 = arith.constant dense<0.000000e+00> : vector<2x8x8xf32>
    %183 = tpu.matmul %181, %182, %cst_66 {dimension_numbers = #tpu.dot_dimension_numbers<[2], [2], [1], [1], [0, 0, 0, 1, 1, 1], [0], [0]>} : vector<2x8x16xbf16>, vector<2x8x16xbf16>, vector<2x8x8xf32> -> vector<2x8x8xf32>
    "tpu.trace_stop"() : () -> ()
    %184 = arith.addf %183, %124 : vector<2x8x8xf32>
    %cst_67 = arith.constant dense<0xFF800000> : vector<2x8xf32>
    %185 = vector.multi_reduction <maximumf>, %184, %cst_67 [2] : vector<2x8x8xf32> to vector<2x8xf32>
    %186 = vector.shape_cast %185 : vector<2x8xf32> to vector<2x8x1xf32>
    %187 = vector.broadcast %186 : vector<2x8x1xf32> to vector<2x8x8xf32>
    %188 = arith.subf %184, %187 : vector<2x8x8xf32>
    %189 = math.exp %188 : vector<2x8x8xf32>
    %cst_68 = arith.constant dense<0.000000e+00> : vector<2x8xf32>
    %190 = vector.multi_reduction <add>, %189, %cst_68 [2] : vector<2x8x8xf32> to vector<2x8xf32>
    %191 = vector.shape_cast %190 : vector<2x8xf32> to vector<2x8x1xf32>
    %192 = tpu.reciprocal %191 {approx = true} : vector<2x8x1xf32> -> vector<2x8x1xf32>
    %193 = vector.broadcast %192 : vector<2x8x1xf32> to vector<2x8x8xf32>
    %194 = arith.mulf %189, %193 : vector<2x8x8xf32>
    %195 = vector.extract_strided_slice %158 {offsets = [0, 0, 16], sizes = [2, 8, 16], strides = [1, 1, 1]} : vector<2x8x32xf32> to vector<2x8x16xf32>
    %196 = arith.truncf %194 : vector<2x8x8xf32> to vector<2x8x8xbf16>
    %197 = arith.truncf %195 : vector<2x8x16xf32> to vector<2x8x16xbf16>
    "tpu.trace_start"() <{level = 10 : i32, message = "bqk,bkd->bqd"}> : () -> ()
    %cst_69 = arith.constant dense<0.000000e+00> : vector<2x8x16xf32>
    %198 = tpu.matmul %196, %197, %cst_69 {dimension_numbers = #tpu.dot_dimension_numbers<[2], [1], [1], [2], [0, 0, 0, 1, 1, 2], [0], [0]>} : vector<2x8x8xbf16>, vector<2x8x16xbf16>, vector<2x8x16xf32> -> vector<2x8x16xf32>
    "tpu.trace_stop"() : () -> ()
    %199 = tpu.concatenate %178, %198 in 2 : vector<2x8x16xf32>, vector<2x8x16xf32> -> vector<2x8x32xf32>
    %200 = vector.shape_cast %199 : vector<2x8x32xf32> to vector<16x32xf32>
    %c168 = arith.constant 168 : index
    %c0_70 = arith.constant 0 : index
    %201 = vector.load %arg5[%c168, %c0_70] : memref<488x128xbf16, #tpu.memory_space<vmem>>, vector<32x32xbf16>
    %202 = arith.truncf %200 : vector<16x32xf32> to vector<16x32xbf16>
    %cst_71 = arith.constant dense<0.000000e+00> : vector<16x32xf32>
    %203 = tpu.matmul %202, %201, %cst_71 {dimension_numbers = #tpu.dot_dimension_numbers<[1], [0], [0], [1], [0, 0, 1, 1], [], []>} : vector<16x32xbf16>, vector<32x32xbf16>, vector<16x32xf32> -> vector<16x32xf32>
    %204 = arith.addf %89, %203 : vector<16x32xf32>
    %c11 = arith.constant 11 : index
    %c0_72 = arith.constant 0 : index
    %205 = vector.load %arg6[%c11, %c0_72] : memref<32x128xf32, #tpu.memory_space<vmem>>, vector<1x32xf32>
    %206 = vector.broadcast %205 : vector<1x32xf32> to vector<16x32xf32>
    %207 = arith.addf %204, %206 : vector<16x32xf32>
    %cst_73 = arith.constant dense<0.000000e+00> : vector<16xf32>
    %208 = vector.multi_reduction <add>, %207, %cst_73 [1] : vector<16x32xf32> to vector<16xf32>
    %209 = vector.shape_cast %208 : vector<16xf32> to vector<16x1xf32>
    %cst_74 = arith.constant 3.200000e+01 : f32
    %210 = vector.broadcast %cst_74 : f32 to vector<16x1xf32>
    %211 = arith.divf %209, %210 : vector<16x1xf32>
    %212 = vector.broadcast %211 : vector<16x1xf32> to vector<16x32xf32>
    %213 = arith.subf %207, %212 : vector<16x32xf32>
    %214 = arith.mulf %213, %213 : vector<16x32xf32>
    %cst_75 = arith.constant dense<0.000000e+00> : vector<16xf32>
    %215 = vector.multi_reduction <add>, %214, %cst_75 [1] : vector<16x32xf32> to vector<16xf32>
    %216 = vector.shape_cast %215 : vector<16xf32> to vector<16x1xf32>
    %cst_76 = arith.constant 3.200000e+01 : f32
    %217 = vector.broadcast %cst_76 : f32 to vector<16x1xf32>
    %218 = arith.divf %216, %217 : vector<16x1xf32>
    %cst_77 = arith.constant 9.99999974E-6 : f32
    %219 = vector.broadcast %cst_77 : f32 to vector<16x1xf32>
    %220 = arith.addf %218, %219 : vector<16x1xf32>
    %221 = math.rsqrt %220 : vector<16x1xf32>
    %222 = vector.broadcast %221 : vector<16x1xf32> to vector<16x32xf32>
    %223 = arith.mulf %213, %222 : vector<16x32xf32>
    %c12 = arith.constant 12 : index
    %c0_78 = arith.constant 0 : index
    %224 = vector.load %arg6[%c12, %c0_78] : memref<32x128xf32, #tpu.memory_space<vmem>>, vector<1x32xf32>
    %225 = vector.broadcast %224 : vector<1x32xf32> to vector<16x32xf32>
    %226 = arith.mulf %223, %225 : vector<16x32xf32>
    %c13 = arith.constant 13 : index
    %c0_79 = arith.constant 0 : index
    %227 = vector.load %arg6[%c13, %c0_79] : memref<32x128xf32, #tpu.memory_space<vmem>>, vector<1x32xf32>
    %228 = vector.broadcast %227 : vector<1x32xf32> to vector<16x32xf32>
    %229 = arith.addf %226, %228 : vector<16x32xf32>
    %c200 = arith.constant 200 : index
    %c0_80 = arith.constant 0 : index
    %230 = vector.load %arg5[%c200, %c0_80] : memref<488x128xbf16, #tpu.memory_space<vmem>>, vector<32x64xbf16>
    %231 = arith.truncf %229 : vector<16x32xf32> to vector<16x32xbf16>
    %cst_81 = arith.constant dense<0.000000e+00> : vector<16x64xf32>
    %232 = tpu.matmul %231, %230, %cst_81 {dimension_numbers = #tpu.dot_dimension_numbers<[1], [0], [0], [1], [0, 0, 1, 1], [], []>} : vector<16x32xbf16>, vector<32x64xbf16>, vector<16x64xf32> -> vector<16x64xf32>
    %c14 = arith.constant 14 : index
    %c0_82 = arith.constant 0 : index
    %233 = vector.load %arg6[%c14, %c0_82] : memref<32x128xf32, #tpu.memory_space<vmem>>, vector<1x64xf32>
    %234 = vector.broadcast %233 : vector<1x64xf32> to vector<16x64xf32>
    %235 = arith.addf %232, %234 : vector<16x64xf32>
    %cst_83 = arith.constant 5.000000e-01 : f32
    %236 = vector.broadcast %cst_83 : f32 to vector<16x64xf32>
    %237 = arith.mulf %236, %235 : vector<16x64xf32>
    %cst_84 = arith.constant 4.471500e-02 : f32
    %238 = vector.broadcast %cst_84 : f32 to vector<16x64xf32>
    %239 = arith.mulf %238, %235 : vector<16x64xf32>
    %240 = arith.mulf %239, %235 : vector<16x64xf32>
    %241 = arith.mulf %240, %235 : vector<16x64xf32>
    %242 = arith.addf %235, %241 : vector<16x64xf32>
    %cst_85 = arith.constant 0.797884583 : f32
    %243 = vector.broadcast %cst_85 : f32 to vector<16x64xf32>
    %244 = arith.mulf %243, %242 : vector<16x64xf32>
    %245 = math.tanh %244 : vector<16x64xf32>
    %cst_86 = arith.constant 1.000000e+00 : f32
    %246 = vector.broadcast %cst_86 : f32 to vector<16x64xf32>
    %247 = arith.addf %246, %245 : vector<16x64xf32>
    %248 = arith.mulf %237, %247 : vector<16x64xf32>
    %c232 = arith.constant 232 : index
    %c0_87 = arith.constant 0 : index
    %249 = vector.load %arg5[%c232, %c0_87] : memref<488x128xbf16, #tpu.memory_space<vmem>>, vector<64x32xbf16>
    %250 = arith.truncf %248 : vector<16x64xf32> to vector<16x64xbf16>
    %cst_88 = arith.constant dense<0.000000e+00> : vector<16x32xf32>
    %251 = tpu.matmul %250, %249, %cst_88 {dimension_numbers = #tpu.dot_dimension_numbers<[1], [0], [0], [1], [0, 0, 1, 1], [], []>} : vector<16x64xbf16>, vector<64x32xbf16>, vector<16x32xf32> -> vector<16x32xf32>
    %c15 = arith.constant 15 : index
    %c0_89 = arith.constant 0 : index
    %252 = vector.load %arg6[%c15, %c0_89] : memref<32x128xf32, #tpu.memory_space<vmem>>, vector<1x32xf32>
    %253 = vector.broadcast %252 : vector<1x32xf32> to vector<16x32xf32>
    %254 = arith.addf %251, %253 : vector<16x32xf32>
    %255 = arith.addf %207, %254 : vector<16x32xf32>
    %c24 = arith.constant 24 : index
    %c0_90 = arith.constant 0 : index
    %256 = vector.load %arg6[%c24, %c0_90] : memref<32x128xf32, #tpu.memory_space<vmem>>, vector<1x32xf32>
    %257 = vector.shape_cast %256 : vector<1x32xf32> to vector<1x32xf32>
    %258 = vector.broadcast %257 : vector<1x32xf32> to vector<2x32xf32>
    %cst_91 = arith.constant dense<0.000000e+00> : vector<16xf32>
    %259 = vector.multi_reduction <add>, %255, %cst_91 [1] : vector<16x32xf32> to vector<16xf32>
    %260 = vector.shape_cast %259 : vector<16xf32> to vector<16x1xf32>
    %cst_92 = arith.constant 3.200000e+01 : f32
    %261 = vector.broadcast %cst_92 : f32 to vector<16x1xf32>
    %262 = arith.divf %260, %261 : vector<16x1xf32>
    %263 = vector.broadcast %262 : vector<16x1xf32> to vector<16x32xf32>
    %264 = arith.subf %255, %263 : vector<16x32xf32>
    %265 = arith.mulf %264, %264 : vector<16x32xf32>
    %cst_93 = arith.constant dense<0.000000e+00> : vector<16xf32>
    %266 = vector.multi_reduction <add>, %265, %cst_93 [1] : vector<16x32xf32> to vector<16xf32>
    %267 = vector.shape_cast %266 : vector<16xf32> to vector<16x1xf32>
    %cst_94 = arith.constant 3.200000e+01 : f32
    %268 = vector.broadcast %cst_94 : f32 to vector<16x1xf32>
    %269 = arith.divf %267, %268 : vector<16x1xf32>
    %cst_95 = arith.constant 9.99999974E-6 : f32
    %270 = vector.broadcast %cst_95 : f32 to vector<16x1xf32>
    %271 = arith.addf %269, %270 : vector<16x1xf32>
    %272 = math.rsqrt %271 : vector<16x1xf32>
    %273 = vector.broadcast %272 : vector<16x1xf32> to vector<16x32xf32>
    %274 = arith.mulf %264, %273 : vector<16x32xf32>
    %c16 = arith.constant 16 : index
    %c0_96 = arith.constant 0 : index
    %275 = vector.load %arg6[%c16, %c0_96] : memref<32x128xf32, #tpu.memory_space<vmem>>, vector<1x32xf32>
    %276 = vector.broadcast %275 : vector<1x32xf32> to vector<16x32xf32>
    %277 = arith.mulf %274, %276 : vector<16x32xf32>
    %c17 = arith.constant 17 : index
    %c0_97 = arith.constant 0 : index
    %278 = vector.load %arg6[%c17, %c0_97] : memref<32x128xf32, #tpu.memory_space<vmem>>, vector<1x32xf32>
    %279 = vector.broadcast %278 : vector<1x32xf32> to vector<16x32xf32>
    %280 = arith.addf %277, %279 : vector<16x32xf32>
    %cst_98 = arith.constant dense<0.000000e+00> : vector<2xf32>
    %281 = vector.multi_reduction <add>, %258, %cst_98 [1] : vector<2x32xf32> to vector<2xf32>
    %282 = vector.shape_cast %281 : vector<2xf32> to vector<2x1xf32>
    %cst_99 = arith.constant 3.200000e+01 : f32
    %283 = vector.broadcast %cst_99 : f32 to vector<2x1xf32>
    %284 = arith.divf %282, %283 : vector<2x1xf32>
    %285 = vector.broadcast %284 : vector<2x1xf32> to vector<2x32xf32>
    %286 = arith.subf %258, %285 : vector<2x32xf32>
    %287 = arith.mulf %286, %286 : vector<2x32xf32>
    %cst_100 = arith.constant dense<0.000000e+00> : vector<2xf32>
    %288 = vector.multi_reduction <add>, %287, %cst_100 [1] : vector<2x32xf32> to vector<2xf32>
    %289 = vector.shape_cast %288 : vector<2xf32> to vector<2x1xf32>
    %cst_101 = arith.constant 3.200000e+01 : f32
    %290 = vector.broadcast %cst_101 : f32 to vector<2x1xf32>
    %291 = arith.divf %289, %290 : vector<2x1xf32>
    %cst_102 = arith.constant 9.99999974E-6 : f32
    %292 = vector.broadcast %cst_102 : f32 to vector<2x1xf32>
    %293 = arith.addf %291, %292 : vector<2x1xf32>
    %294 = math.rsqrt %293 : vector<2x1xf32>
    %295 = vector.broadcast %294 : vector<2x1xf32> to vector<2x32xf32>
    %296 = arith.mulf %286, %295 : vector<2x32xf32>
    %c16_103 = arith.constant 16 : index
    %c0_104 = arith.constant 0 : index
    %297 = vector.load %arg6[%c16_103, %c0_104] : memref<32x128xf32, #tpu.memory_space<vmem>>, vector<1x32xf32>
    %298 = vector.broadcast %297 : vector<1x32xf32> to vector<2x32xf32>
    %299 = arith.mulf %296, %298 : vector<2x32xf32>
    %c17_105 = arith.constant 17 : index
    %c0_106 = arith.constant 0 : index
    %300 = vector.load %arg6[%c17_105, %c0_106] : memref<32x128xf32, #tpu.memory_space<vmem>>, vector<1x32xf32>
    %301 = vector.broadcast %300 : vector<1x32xf32> to vector<2x32xf32>
    %302 = arith.addf %299, %301 : vector<2x32xf32>
    %c296 = arith.constant 296 : index
    %c0_107 = arith.constant 0 : index
    %303 = vector.load %arg5[%c296, %c0_107] : memref<488x128xbf16, #tpu.memory_space<vmem>>, vector<32x96xbf16>
    %304 = arith.truncf %302 : vector<2x32xf32> to vector<2x32xbf16>
    %cst_108 = arith.constant dense<0.000000e+00> : vector<2x96xf32>
    %305 = tpu.matmul %304, %303, %cst_108 {dimension_numbers = #tpu.dot_dimension_numbers<[1], [0], [0], [1], [0, 0, 1, 1], [], []>} : vector<2x32xbf16>, vector<32x96xbf16>, vector<2x96xf32> -> vector<2x96xf32>
    %c18 = arith.constant 18 : index
    %c0_109 = arith.constant 0 : index
    %306 = vector.load %arg6[%c18, %c0_109] : memref<32x128xf32, #tpu.memory_space<vmem>>, vector<1x96xf32>
    %307 = vector.broadcast %306 : vector<1x96xf32> to vector<2x96xf32>
    %308 = arith.addf %305, %307 : vector<2x96xf32>
    %c296_110 = arith.constant 296 : index
    %c0_111 = arith.constant 0 : index
    %309 = vector.load %arg5[%c296_110, %c0_111] : memref<488x128xbf16, #tpu.memory_space<vmem>>, vector<32x96xbf16>
    %310 = arith.truncf %280 : vector<16x32xf32> to vector<16x32xbf16>
    %cst_112 = arith.constant dense<0.000000e+00> : vector<16x96xf32>
    %311 = tpu.matmul %310, %309, %cst_112 {dimension_numbers = #tpu.dot_dimension_numbers<[1], [0], [0], [1], [0, 0, 1, 1], [], []>} : vector<16x32xbf16>, vector<32x96xbf16>, vector<16x96xf32> -> vector<16x96xf32>
    %c18_113 = arith.constant 18 : index
    %c0_114 = arith.constant 0 : index
    %312 = vector.load %arg6[%c18_113, %c0_114] : memref<32x128xf32, #tpu.memory_space<vmem>>, vector<1x96xf32>
    %313 = vector.broadcast %312 : vector<1x96xf32> to vector<16x96xf32>
    %314 = arith.addf %311, %313 : vector<16x96xf32>
    %315 = vector.extract_strided_slice %308 {offsets = [0, 0], sizes = [2, 32], strides = [1, 1]} : vector<2x96xf32> to vector<2x32xf32>
    %316 = vector.shape_cast %315 : vector<2x32xf32> to vector<2x1x32xf32>
    %317 = vector.extract_strided_slice %308 {offsets = [0, 32], sizes = [2, 32], strides = [1, 1]} : vector<2x96xf32> to vector<2x32xf32>
    %318 = vector.shape_cast %317 : vector<2x32xf32> to vector<2x1x32xf32>
    %319 = vector.extract_strided_slice %308 {offsets = [0, 64], sizes = [2, 32], strides = [1, 1]} : vector<2x96xf32> to vector<2x32xf32>
    %320 = vector.shape_cast %319 : vector<2x32xf32> to vector<2x1x32xf32>
    %321 = vector.extract_strided_slice %314 {offsets = [0, 32], sizes = [16, 32], strides = [1, 1]} : vector<16x96xf32> to vector<16x32xf32>
    %322 = vector.shape_cast %321 : vector<16x32xf32> to vector<2x8x32xf32>
    %323 = vector.extract_strided_slice %314 {offsets = [0, 64], sizes = [16, 32], strides = [1, 1]} : vector<16x96xf32> to vector<16x32xf32>
    %324 = vector.shape_cast %323 : vector<16x32xf32> to vector<2x8x32xf32>
    %325 = vector.extract_strided_slice %316 {offsets = [0, 0, 0], sizes = [2, 1, 16], strides = [1, 1, 1]} : vector<2x1x32xf32> to vector<2x1x16xf32>
    %326 = vector.extract_strided_slice %318 {offsets = [0, 0, 0], sizes = [2, 1, 16], strides = [1, 1, 1]} : vector<2x1x32xf32> to vector<2x1x16xf32>
    %327 = vector.extract_strided_slice %320 {offsets = [0, 0, 0], sizes = [2, 1, 16], strides = [1, 1, 1]} : vector<2x1x32xf32> to vector<2x1x16xf32>
    %328 = arith.mulf %325, %326 : vector<2x1x16xf32>
    %cst_115 = arith.constant dense<0.000000e+00> : vector<2x1xf32>
    %329 = vector.multi_reduction <add>, %328, %cst_115 [2] : vector<2x1x16xf32> to vector<2x1xf32>
    %330 = vector.shape_cast %329 : vector<2x1xf32> to vector<2x1x1xf32>
    %331 = vector.extract_strided_slice %322 {offsets = [0, 0, 0], sizes = [2, 8, 16], strides = [1, 1, 1]} : vector<2x8x32xf32> to vector<2x8x16xf32>
    %332 = arith.truncf %325 : vector<2x1x16xf32> to vector<2x1x16xbf16>
    %333 = arith.truncf %331 : vector<2x8x16xf32> to vector<2x8x16xbf16>
    "tpu.trace_start"() <{level = 10 : i32, message = "bqd,bkd->bqk"}> : () -> ()
    %cst_116 = arith.constant dense<0.000000e+00> : vector<2x1x8xf32>
    %334 = tpu.matmul %332, %333, %cst_116 {dimension_numbers = #tpu.dot_dimension_numbers<[2], [2], [1], [1], [0, 0, 0, 1, 1, 1], [0], [0]>} : vector<2x1x16xbf16>, vector<2x8x16xbf16>, vector<2x1x8xf32> -> vector<2x1x8xf32>
    "tpu.trace_stop"() : () -> ()
    %335 = arith.addf %334, %3 : vector<2x1x8xf32>
    %cst_117 = arith.constant dense<0xFF800000> : vector<2x1xf32>
    %336 = vector.multi_reduction <maximumf>, %335, %cst_117 [2] : vector<2x1x8xf32> to vector<2x1xf32>
    %337 = vector.shape_cast %336 : vector<2x1xf32> to vector<2x1x1xf32>
    %338 = arith.maximumf %337, %330 : vector<2x1x1xf32>
    %339 = arith.subf %330, %338 : vector<2x1x1xf32>
    %340 = math.exp %339 : vector<2x1x1xf32>
    %341 = vector.broadcast %338 : vector<2x1x1xf32> to vector<2x1x8xf32>
    %342 = arith.subf %335, %341 : vector<2x1x8xf32>
    %343 = math.exp %342 : vector<2x1x8xf32>
    %cst_118 = arith.constant dense<0.000000e+00> : vector<2x1xf32>
    %344 = vector.multi_reduction <add>, %343, %cst_118 [2] : vector<2x1x8xf32> to vector<2x1xf32>
    %345 = vector.shape_cast %344 : vector<2x1xf32> to vector<2x1x1xf32>
    %346 = arith.addf %340, %345 : vector<2x1x1xf32>
    %347 = tpu.reciprocal %346 {approx = true} : vector<2x1x1xf32> -> vector<2x1x1xf32>
    %348 = vector.broadcast %340 : vector<2x1x1xf32> to vector<2x1x16xf32>
    %349 = arith.mulf %348, %327 : vector<2x1x16xf32>
    %350 = vector.extract_strided_slice %324 {offsets = [0, 0, 0], sizes = [2, 8, 16], strides = [1, 1, 1]} : vector<2x8x32xf32> to vector<2x8x16xf32>
    %351 = arith.truncf %343 : vector<2x1x8xf32> to vector<2x1x8xbf16>
    %352 = arith.truncf %350 : vector<2x8x16xf32> to vector<2x8x16xbf16>
    "tpu.trace_start"() <{level = 10 : i32, message = "bqk,bkd->bqd"}> : () -> ()
    %cst_119 = arith.constant dense<0.000000e+00> : vector<2x1x16xf32>
    %353 = tpu.matmul %351, %352, %cst_119 {dimension_numbers = #tpu.dot_dimension_numbers<[2], [1], [1], [2], [0, 0, 0, 1, 1, 2], [0], [0]>} : vector<2x1x8xbf16>, vector<2x8x16xbf16>, vector<2x1x16xf32> -> vector<2x1x16xf32>
    "tpu.trace_stop"() : () -> ()
    %354 = arith.addf %349, %353 : vector<2x1x16xf32>
    %355 = vector.broadcast %347 : vector<2x1x1xf32> to vector<2x1x16xf32>
    %356 = arith.mulf %354, %355 : vector<2x1x16xf32>
    %357 = vector.extract_strided_slice %316 {offsets = [0, 0, 16], sizes = [2, 1, 16], strides = [1, 1, 1]} : vector<2x1x32xf32> to vector<2x1x16xf32>
    %358 = vector.extract_strided_slice %318 {offsets = [0, 0, 16], sizes = [2, 1, 16], strides = [1, 1, 1]} : vector<2x1x32xf32> to vector<2x1x16xf32>
    %359 = vector.extract_strided_slice %320 {offsets = [0, 0, 16], sizes = [2, 1, 16], strides = [1, 1, 1]} : vector<2x1x32xf32> to vector<2x1x16xf32>
    %360 = arith.mulf %357, %358 : vector<2x1x16xf32>
    %cst_120 = arith.constant dense<0.000000e+00> : vector<2x1xf32>
    %361 = vector.multi_reduction <add>, %360, %cst_120 [2] : vector<2x1x16xf32> to vector<2x1xf32>
    %362 = vector.shape_cast %361 : vector<2x1xf32> to vector<2x1x1xf32>
    %363 = vector.extract_strided_slice %322 {offsets = [0, 0, 16], sizes = [2, 8, 16], strides = [1, 1, 1]} : vector<2x8x32xf32> to vector<2x8x16xf32>
    %364 = arith.truncf %357 : vector<2x1x16xf32> to vector<2x1x16xbf16>
    %365 = arith.truncf %363 : vector<2x8x16xf32> to vector<2x8x16xbf16>
    "tpu.trace_start"() <{level = 10 : i32, message = "bqd,bkd->bqk"}> : () -> ()
    %cst_121 = arith.constant dense<0.000000e+00> : vector<2x1x8xf32>
    %366 = tpu.matmul %364, %365, %cst_121 {dimension_numbers = #tpu.dot_dimension_numbers<[2], [2], [1], [1], [0, 0, 0, 1, 1, 1], [0], [0]>} : vector<2x1x16xbf16>, vector<2x8x16xbf16>, vector<2x1x8xf32> -> vector<2x1x8xf32>
    "tpu.trace_stop"() : () -> ()
    %367 = arith.addf %366, %3 : vector<2x1x8xf32>
    %cst_122 = arith.constant dense<0xFF800000> : vector<2x1xf32>
    %368 = vector.multi_reduction <maximumf>, %367, %cst_122 [2] : vector<2x1x8xf32> to vector<2x1xf32>
    %369 = vector.shape_cast %368 : vector<2x1xf32> to vector<2x1x1xf32>
    %370 = arith.maximumf %369, %362 : vector<2x1x1xf32>
    %371 = arith.subf %362, %370 : vector<2x1x1xf32>
    %372 = math.exp %371 : vector<2x1x1xf32>
    %373 = vector.broadcast %370 : vector<2x1x1xf32> to vector<2x1x8xf32>
    %374 = arith.subf %367, %373 : vector<2x1x8xf32>
    %375 = math.exp %374 : vector<2x1x8xf32>
    %cst_123 = arith.constant dense<0.000000e+00> : vector<2x1xf32>
    %376 = vector.multi_reduction <add>, %375, %cst_123 [2] : vector<2x1x8xf32> to vector<2x1xf32>
    %377 = vector.shape_cast %376 : vector<2x1xf32> to vector<2x1x1xf32>
    %378 = arith.addf %372, %377 : vector<2x1x1xf32>
    %379 = tpu.reciprocal %378 {approx = true} : vector<2x1x1xf32> -> vector<2x1x1xf32>
    %380 = vector.broadcast %372 : vector<2x1x1xf32> to vector<2x1x16xf32>
    %381 = arith.mulf %380, %359 : vector<2x1x16xf32>
    %382 = vector.extract_strided_slice %324 {offsets = [0, 0, 16], sizes = [2, 8, 16], strides = [1, 1, 1]} : vector<2x8x32xf32> to vector<2x8x16xf32>
    %383 = arith.truncf %375 : vector<2x1x8xf32> to vector<2x1x8xbf16>
    %384 = arith.truncf %382 : vector<2x8x16xf32> to vector<2x8x16xbf16>
    "tpu.trace_start"() <{level = 10 : i32, message = "bqk,bkd->bqd"}> : () -> ()
    %cst_124 = arith.constant dense<0.000000e+00> : vector<2x1x16xf32>
    %385 = tpu.matmul %383, %384, %cst_124 {dimension_numbers = #tpu.dot_dimension_numbers<[2], [1], [1], [2], [0, 0, 0, 1, 1, 2], [0], [0]>} : vector<2x1x8xbf16>, vector<2x8x16xbf16>, vector<2x1x16xf32> -> vector<2x1x16xf32>
    "tpu.trace_stop"() : () -> ()
    %386 = arith.addf %381, %385 : vector<2x1x16xf32>
    %387 = vector.broadcast %379 : vector<2x1x1xf32> to vector<2x1x16xf32>
    %388 = arith.mulf %386, %387 : vector<2x1x16xf32>
    %389 = tpu.concatenate %356, %388 in 2 : vector<2x1x16xf32>, vector<2x1x16xf32> -> vector<2x1x32xf32>
    %390 = vector.shape_cast %389 : vector<2x1x32xf32> to vector<2x32xf32>
    %c328 = arith.constant 328 : index
    %c0_125 = arith.constant 0 : index
    %391 = vector.load %arg5[%c328, %c0_125] : memref<488x128xbf16, #tpu.memory_space<vmem>>, vector<32x32xbf16>
    %392 = arith.truncf %390 : vector<2x32xf32> to vector<2x32xbf16>
    %cst_126 = arith.constant dense<0.000000e+00> : vector<2x32xf32>
    %393 = tpu.matmul %392, %391, %cst_126 {dimension_numbers = #tpu.dot_dimension_numbers<[1], [0], [0], [1], [0, 0, 1, 1], [], []>} : vector<2x32xbf16>, vector<32x32xbf16>, vector<2x32xf32> -> vector<2x32xf32>
    %394 = arith.addf %258, %393 : vector<2x32xf32>
    %c19 = arith.constant 19 : index
    %c0_127 = arith.constant 0 : index
    %395 = vector.load %arg6[%c19, %c0_127] : memref<32x128xf32, #tpu.memory_space<vmem>>, vector<1x32xf32>
    %396 = vector.broadcast %395 : vector<1x32xf32> to vector<2x32xf32>
    %397 = arith.addf %394, %396 : vector<2x32xf32>
    %cst_128 = arith.constant dense<0.000000e+00> : vector<2xf32>
    %398 = vector.multi_reduction <add>, %397, %cst_128 [1] : vector<2x32xf32> to vector<2xf32>
    %399 = vector.shape_cast %398 : vector<2xf32> to vector<2x1xf32>
    %cst_129 = arith.constant 3.200000e+01 : f32
    %400 = vector.broadcast %cst_129 : f32 to vector<2x1xf32>
    %401 = arith.divf %399, %400 : vector<2x1xf32>
    %402 = vector.broadcast %401 : vector<2x1xf32> to vector<2x32xf32>
    %403 = arith.subf %397, %402 : vector<2x32xf32>
    %404 = arith.mulf %403, %403 : vector<2x32xf32>
    %cst_130 = arith.constant dense<0.000000e+00> : vector<2xf32>
    %405 = vector.multi_reduction <add>, %404, %cst_130 [1] : vector<2x32xf32> to vector<2xf32>
    %406 = vector.shape_cast %405 : vector<2xf32> to vector<2x1xf32>
    %cst_131 = arith.constant 3.200000e+01 : f32
    %407 = vector.broadcast %cst_131 : f32 to vector<2x1xf32>
    %408 = arith.divf %406, %407 : vector<2x1xf32>
    %cst_132 = arith.constant 9.99999974E-6 : f32
    %409 = vector.broadcast %cst_132 : f32 to vector<2x1xf32>
    %410 = arith.addf %408, %409 : vector<2x1xf32>
    %411 = math.rsqrt %410 : vector<2x1xf32>
    %412 = vector.broadcast %411 : vector<2x1xf32> to vector<2x32xf32>
    %413 = arith.mulf %403, %412 : vector<2x32xf32>
    %c20 = arith.constant 20 : index
    %c0_133 = arith.constant 0 : index
    %414 = vector.load %arg6[%c20, %c0_133] : memref<32x128xf32, #tpu.memory_space<vmem>>, vector<1x32xf32>
    %415 = vector.broadcast %414 : vector<1x32xf32> to vector<2x32xf32>
    %416 = arith.mulf %413, %415 : vector<2x32xf32>
    %c21 = arith.constant 21 : index
    %c0_134 = arith.constant 0 : index
    %417 = vector.load %arg6[%c21, %c0_134] : memref<32x128xf32, #tpu.memory_space<vmem>>, vector<1x32xf32>
    %418 = vector.broadcast %417 : vector<1x32xf32> to vector<2x32xf32>
    %419 = arith.addf %416, %418 : vector<2x32xf32>
    %c360 = arith.constant 360 : index
    %c0_135 = arith.constant 0 : index
    %420 = vector.load %arg5[%c360, %c0_135] : memref<488x128xbf16, #tpu.memory_space<vmem>>, vector<32x64xbf16>
    %421 = arith.truncf %419 : vector<2x32xf32> to vector<2x32xbf16>
    %cst_136 = arith.constant dense<0.000000e+00> : vector<2x64xf32>
    %422 = tpu.matmul %421, %420, %cst_136 {dimension_numbers = #tpu.dot_dimension_numbers<[1], [0], [0], [1], [0, 0, 1, 1], [], []>} : vector<2x32xbf16>, vector<32x64xbf16>, vector<2x64xf32> -> vector<2x64xf32>
    %c22 = arith.constant 22 : index
    %c0_137 = arith.constant 0 : index
    %423 = vector.load %arg6[%c22, %c0_137] : memref<32x128xf32, #tpu.memory_space<vmem>>, vector<1x64xf32>
    %424 = vector.broadcast %423 : vector<1x64xf32> to vector<2x64xf32>
    %425 = arith.addf %422, %424 : vector<2x64xf32>
    %cst_138 = arith.constant 5.000000e-01 : f32
    %426 = vector.broadcast %cst_138 : f32 to vector<2x64xf32>
    %427 = arith.mulf %426, %425 : vector<2x64xf32>
    %cst_139 = arith.constant 4.471500e-02 : f32
    %428 = vector.broadcast %cst_139 : f32 to vector<2x64xf32>
    %429 = arith.mulf %428, %425 : vector<2x64xf32>
    %430 = arith.mulf %429, %425 : vector<2x64xf32>
    %431 = arith.mulf %430, %425 : vector<2x64xf32>
    %432 = arith.addf %425, %431 : vector<2x64xf32>
    %cst_140 = arith.constant 0.797884583 : f32
    %433 = vector.broadcast %cst_140 : f32 to vector<2x64xf32>
    %434 = arith.mulf %433, %432 : vector<2x64xf32>
    %435 = math.tanh %434 : vector<2x64xf32>
    %cst_141 = arith.constant 1.000000e+00 : f32
    %436 = vector.broadcast %cst_141 : f32 to vector<2x64xf32>
    %437 = arith.addf %436, %435 : vector<2x64xf32>
    %438 = arith.mulf %427, %437 : vector<2x64xf32>
    %c392 = arith.constant 392 : index
    %c0_142 = arith.constant 0 : index
    %439 = vector.load %arg5[%c392, %c0_142] : memref<488x128xbf16, #tpu.memory_space<vmem>>, vector<64x32xbf16>
    %440 = arith.truncf %438 : vector<2x64xf32> to vector<2x64xbf16>
    %cst_143 = arith.constant dense<0.000000e+00> : vector<2x32xf32>
    %441 = tpu.matmul %440, %439, %cst_143 {dimension_numbers = #tpu.dot_dimension_numbers<[1], [0], [0], [1], [0, 0, 1, 1], [], []>} : vector<2x64xbf16>, vector<64x32xbf16>, vector<2x32xf32> -> vector<2x32xf32>
    %c23 = arith.constant 23 : index
    %c0_144 = arith.constant 0 : index
    %442 = vector.load %arg6[%c23, %c0_144] : memref<32x128xf32, #tpu.memory_space<vmem>>, vector<1x32xf32>
    %443 = vector.broadcast %442 : vector<1x32xf32> to vector<2x32xf32>
    %444 = arith.addf %441, %443 : vector<2x32xf32>
    %445 = arith.addf %397, %444 : vector<2x32xf32>
    %cst_145 = arith.constant dense<0.000000e+00> : vector<2xf32>
    %446 = vector.multi_reduction <add>, %445, %cst_145 [1] : vector<2x32xf32> to vector<2xf32>
    %447 = vector.shape_cast %446 : vector<2xf32> to vector<2x1xf32>
    %cst_146 = arith.constant 3.200000e+01 : f32
    %448 = vector.broadcast %cst_146 : f32 to vector<2x1xf32>
    %449 = arith.divf %447, %448 : vector<2x1xf32>
    %450 = vector.broadcast %449 : vector<2x1xf32> to vector<2x32xf32>
    %451 = arith.subf %445, %450 : vector<2x32xf32>
    %452 = arith.mulf %451, %451 : vector<2x32xf32>
    %cst_147 = arith.constant dense<0.000000e+00> : vector<2xf32>
    %453 = vector.multi_reduction <add>, %452, %cst_147 [1] : vector<2x32xf32> to vector<2xf32>
    %454 = vector.shape_cast %453 : vector<2xf32> to vector<2x1xf32>
    %cst_148 = arith.constant 3.200000e+01 : f32
    %455 = vector.broadcast %cst_148 : f32 to vector<2x1xf32>
    %456 = arith.divf %454, %455 : vector<2x1xf32>
    %cst_149 = arith.constant 9.99999974E-6 : f32
    %457 = vector.broadcast %cst_149 : f32 to vector<2x1xf32>
    %458 = arith.addf %456, %457 : vector<2x1xf32>
    %459 = math.rsqrt %458 : vector<2x1xf32>
    %460 = vector.broadcast %459 : vector<2x1xf32> to vector<2x32xf32>
    %461 = arith.mulf %451, %460 : vector<2x32xf32>
    %c25 = arith.constant 25 : index
    %c0_150 = arith.constant 0 : index
    %462 = vector.load %arg6[%c25, %c0_150] : memref<32x128xf32, #tpu.memory_space<vmem>>, vector<1x32xf32>
    %463 = vector.broadcast %462 : vector<1x32xf32> to vector<2x32xf32>
    %464 = arith.mulf %461, %463 : vector<2x32xf32>
    %c26 = arith.constant 26 : index
    %c0_151 = arith.constant 0 : index
    %465 = vector.load %arg6[%c26, %c0_151] : memref<32x128xf32, #tpu.memory_space<vmem>>, vector<1x32xf32>
    %466 = vector.broadcast %465 : vector<1x32xf32> to vector<2x32xf32>
    %467 = arith.addf %464, %466 : vector<2x32xf32>
    %c0_152 = arith.constant 0 : index
    %c0_153 = arith.constant 0 : index
    %c0_154 = arith.constant 0 : index
    %468 = vector.load %arg7[%c0_152, %c0_153, %c0_154] : memref<1x2x32xf32, #tpu.memory_space<vmem>>, vector<1x2x32xf32>
    %469 = vector.shape_cast %468 : vector<1x2x32xf32> to vector<2x32xf32>
    %470 = vector.shape_cast %467 : vector<2x32xf32> to vector<1x2x32xf32>
    tpu.vector_store %arg7[%c0_152, %c0_153, %c0_154], %470 {strides = array<i32>} : memref<1x2x32xf32, #tpu.memory_space<vmem>>, vector<1x2x32xf32>,
    %c456 = arith.constant 456 : index
    %c0_155 = arith.constant 0 : index
    %471 = vector.load %arg5[%c456, %c0_155] : memref<488x128xbf16, #tpu.memory_space<vmem>>, vector<32x2xbf16>
    %472 = arith.truncf %467 : vector<2x32xf32> to vector<2x32xbf16>
    %cst_156 = arith.constant dense<0.000000e+00> : vector<2x2xf32>
    %473 = tpu.matmul %472, %471, %cst_156 {dimension_numbers = #tpu.dot_dimension_numbers<[1], [0], [0], [1], [0, 0, 1, 1], [], []>} : vector<2x32xbf16>, vector<32x2xbf16>, vector<2x2xf32> -> vector<2x2xf32>
    %c27 = arith.constant 27 : index
    %c0_157 = arith.constant 0 : index
    %474 = vector.load %arg6[%c27, %c0_157] : memref<32x128xf32, #tpu.memory_space<vmem>>, vector<1x2xf32>
    %475 = vector.broadcast %474 : vector<1x2xf32> to vector<2x2xf32>
    %476 = arith.addf %473, %475 : vector<2x2xf32>
    %c0_158 = arith.constant 0 : index
    %c0_159 = arith.constant 0 : index
    %c0_160 = arith.constant 0 : index
    %477 = vector.load %arg8[%c0_158, %c0_159, %c0_160] : memref<1x2x2xf32, #tpu.memory_space<vmem>>, vector<1x2x2xf32>
    %478 = vector.shape_cast %477 : vector<1x2x2xf32> to vector<2x2xf32>
    %479 = vector.shape_cast %476 : vector<2x2xf32> to vector<1x2x2xf32>
    tpu.vector_store %arg8[%c0_158, %c0_159, %c0_160], %479 {strides = array<i32>} : memref<1x2x2xf32, #tpu.memory_space<vmem>>, vector<1x2x2xf32>,
    return
  }
  func.func @transform_0(%arg0: i32) -> (i32, i32, i32) {
    %c0_i32 = arith.constant 0 : i32
    %c0_i32_0 = arith.constant 0 : i32
    %c0_i32_1 = arith.constant 0 : i32
    return %arg0, %c0_i32, %c0_i32_0 : i32, i32, i32
  }
  func.func @transform_1(%arg0: i32) -> (i32, i32, i32) {
    %c0_i32 = arith.constant 0 : i32
    %c0_i32_0 = arith.constant 0 : i32
    %c0_i32_1 = arith.constant 0 : i32
    return %arg0, %c0_i32, %c0_i32_0 : i32, i32, i32
  }
  func.func @transform_2(%arg0: i32) -> (i32, i32, i32) {
    %c0_i32 = arith.constant 0 : i32
    %c0_i32_0 = arith.constant 0 : i32
    %c0_i32_1 = arith.constant 0 : i32
    return %arg0, %c0_i32, %c0_i32_0 : i32, i32, i32
  }
  func.func @transform_3(%arg0: i32) -> (i32, i32, i32, i32) {
    %c0_i32 = arith.constant 0 : i32
    %c0_i32_0 = arith.constant 0 : i32
    %c0_i32_1 = arith.constant 0 : i32
    %c0_i32_2 = arith.constant 0 : i32
    return %arg0, %c0_i32, %c0_i32_0, %c0_i32_1 : i32, i32, i32, i32
  }
  func.func @transform_4(%arg0: i32) -> (i32, i32) {
    %c0_i32 = arith.constant 0 : i32
    %c0_i32_0 = arith.constant 0 : i32
    %c0_i32_1 = arith.constant 0 : i32
    return %c0_i32, %c0_i32_0 : i32, i32
  }
  func.func @transform_5(%arg0: i32) -> (i32, i32) {
    %c0_i32 = arith.constant 0 : i32
    %c0_i32_0 = arith.constant 0 : i32
    %c0_i32_1 = arith.constant 0 : i32
    return %c0_i32, %c0_i32_0 : i32, i32
  }
  func.func @transform_6(%arg0: i32) -> (i32, i32, i32) {
    %c0_i32 = arith.constant 0 : i32
    %c0_i32_0 = arith.constant 0 : i32
    %c0_i32_1 = arith.constant 0 : i32
    return %arg0, %c0_i32, %c0_i32_0 : i32, i32, i32
  }
  func.func @transform_7(%arg0: i32) -> (i32, i32, i32) {
    %c0_i32 = arith.constant 0 : i32
    %c0_i32_0 = arith.constant 0 : i32
    %c0_i32_1 = arith.constant 0 : i32
    return %arg0, %c0_i32, %c0_i32_0 : i32, i32, i32
  }
}

</mosaic_0001>

<bundles_post_ra>
// kernel: _fused_forward.1
= control target key start
LH: loop header
LB: loop body
LE: loop exit
PB: predicated region body
PF: predicated region fallthrough
CT: control target
= control target key end

     0   :  { %13 = vsyncpa [#allocation3], 0  ;;  %vm34_vm0 = vcmask 31744   ;;  %s3672_s0 = inlined_call_operand.vmem [shape: f32[1,16,4], index: 0, kind: input, shape index: {}]   ;;  %s3673_s1 = inlined_call_operand.vmem [shape: f32[1,16,32], index: 1, kind: input, shape index: {}]   ;;  %s3674_s2 = inlined_call_operand.vmem [shape: f32[1,16,1], index: 2, kind: input, shape index: {}]   ;;  %s3675_s3 = inlined_call_operand.vmem [shape: f32[1,2,1,8], index: 3, kind: input, shape index: {}]   ;;  %s3676_s4 = inlined_call_operand.vmem [shape: bf16[488,128], index: 4, kind: input, shape index: {}]   ;;  %s3677_s5 = inlined_call_operand.vmem [shape: f32[32,128], index: 5, kind: input, shape index: {}]   ;;  %s3678_s6 = inlined_call_operand.hbm [shape: f32[1,2,32], index: 6, kind: output, shape index: {0}]   ;;  %s3679_s7 = inlined_call_operand.hbm [shape: f32[1,2,2], index: 7, kind: output, shape index: {1}]  }
   0x1   :  { %v32_v0 = vld [vmem:[%s3672_s0] sm:$0xff]  ;;  %v33_v1 = vld [vmem:[%s3672_s0 + $0x8] sm:$0xff] }
   0x2   :  { %v35_v2 = vsel %vm34_vm0, %v32_v0, 0.0  ;;  %v38_v3 = vsel %vm34_vm0, %v33_v1, 0.0 }
   0x3   :  { %36 = vadd.xlane.f32.xlu0 %v35_v2 }
   0x7   :  { %39 = vadd.xlane.f32.xlu0 %v38_v3 }
   0x8   :  { %14 = vsyncpa [#allocation5], 0  ;;  %v76_v14 = vld [vmem:[%s3676_s4] sm:$0x3]  ;;  %vm86_vm1 = vcmask 1041408   ;;  %v3005_v15 = vmov 0.0  }
   0x9   :  { %2604 = vmatprep.subr.bf16.mxu0 %v3005_v15  ;;  %v88_v16 = vsel %vm86_vm1, %v76_v14, 0  ;;  %vm3006_vm2 = vmmov 0   ;;  %2610 = vmatprep.subr.bf16.mxu1 %v3005_v15  ;;  %v2437_v25 = vld [vmem:[%s3677_s5] ss:$0 sm:$0xff]  ;;  %v2438_v29 = vld [vmem:[%s3677_s5 + $0x1] ss:$0 sm:$0xff] }
   0xa   :  { %2606 = vmatprep.mubr.msk.bf16.mxu0 %vm3006_vm2, %v3005_v15  ;;  %2605 = vmatpush3.bf16.msra.mxu0 %v88_v16  ;;  %v2439_v34 = vld [vmem:[%s3677_s5 + $0x2] ss:$0 sm:$0xff]  ;;  %vm149_vm3 = vcmask 261120   ;;  %vm411_vm4 = vcmask 523264   ;;  %s3008_s27 = smov 96   ;;  %vm589_vm5 = vcmask 130048  }
   0xb   :  { %2614 = vmatprep.mubr.msk.bf16.mxu1 %vm3006_vm2, %v3005_v15  ;;  %2618 = vmatprep.subr.bf16.mxu0 %v3005_v15  ;;  %vm685_vm6 = vcmask 64512   ;;  %s3010_s9 = smov 80   ;;  %s3011_s10 = smov 112   ;;  %vm715_vm7 = vcmask 1043456   ;;  %vm1526_vm8 = vcmask 122880   ;;  %vm1635_vm9 = vcmask 57344  }
   0xc   :  { %s3012_s11 = smov 8   ;;  %s3013_s12 = smov 120   ;;  %vm2069_vm10 = vcmask 1041409   ;;  %vm2134_vm11 = vcmask 254976  }
   0xd   :  { %s3014_s13 = smov 48   ;;  %s3015_s18 = smov 16  }
  0x90   :  { %v37_v4 = vpop.xlane.xlu0 %36 }
  0x91   :  { %v42_v5 = vmul.f32 0.25, %v37_v4 }
  0x93   :  { %v44_v6 = vsub.f32 %v32_v0, %v42_v5 }
  0x94   :  { %v40_v7 = vpop.xlane.xlu0 %39 }
  0x95   :  { %v43_v8 = vmul.f32 0.25, %v40_v7  ;;  %v46_v9 = vmul.f32 %v44_v6, %v44_v6  ;;  %v2843_v7 = vld [vmem:[%s3676_s4 + $0x4] sm:$0xff]  }
  0x96   :  { %2611 = vmatpush3.bf16.msra.mxu1 %v2843_v7 }
  0x97   :  { %v45_v10 = vsub.f32 %v33_v1, %v43_v8  ;;  %v48_v11 = vsel %vm34_vm0, %v46_v9, 0.0  ;;  %v2844_v8 = vld [vmem:[%s3676_s4 + $0xc] sm:$0xff]   ;;  %2612 = vmatprep.subr.bf16.mxu1 %v3005_v15  ;;  %v28_v9 = vld [vmem:[%s3674_s2] sm:$0xff] }
  0x98   :  { %49 = vadd.xlane.f32.xlu1 %v48_v11  ;;  %v3007_v11 = vmov 0  }
  0x99   :  { %v47_v12 = vmul.f32 %v45_v10, %v45_v10  ;;  %2836 = vset.pattern.permute.xlu0 %v3007_v11  ;;  %2837 = vset.pattern.permute.xlu1 %v3007_v11 }
  0x9a   :  { %2613 = vmatpush3.bf16.msra.mxu1 %v2844_v8 }
  0x9b   :  { %v51_v13 = vsel %vm34_vm0, %v47_v12, 0.0  ;;  %2626 = vmatprep.subr.bf16.mxu1 %v3005_v15 }
  0x9c   :  { %52 = vadd.xlane.f32.xlu1 %v51_v13 }
 0x125   :  { %v50_v17 = vpop.xlane.xlu1 %49 }
 0x126   :  { %v54_v18 = vmul.f32 0.25, %v50_v17 }
 0x128   :  { %v56_v19 = vadd.f32 1e-05, %v54_v18 }
 0x129   :  { %v53_v20 = vpop.xlane.xlu1 %52 }
 0x12a   :  { %2873 = vrsqrt.f32 %v56_v19  ;;  %v55_v21 = vmul.f32 0.25, %v53_v20  ;;  %v2441_v20 = vld [vmem:[%s3677_s5 + $0x3] ss:$0 sm:$0xff] }
 0x12c   :  { %v57_v22 = vadd.f32 1e-05, %v55_v21 }
 0x12e   :  { %2875 = vrsqrt.f32 %v57_v22 }
 0x134   :  { %v2874_v23 = vpop.eup %2873 }
 0x135   :  { %v60_v24 = vmul.f32 %v2874_v23, %v44_v6 }
 0x137   :  { %v67_v28 = vmul.f32 %v2437_v25, %v60_v24 }
 0x138   :  { %v2876_v26 = vpop.eup %2875 }
 0x139   :  { %v61_v27 = vmul.f32 %v2876_v26, %v45_v10  ;;  %v74_v31 = vadd.f32 %v2438_v29, %v67_v28  ;;  %v29_v10 = vld [vmem:[%s3674_s2 + $0x8] sm:$0xff] }
 0x13b   :  { %v68_v30 = vmul.f32 %v2437_v25, %v61_v27  ;;  %v2442_v25 = vld [vmem:[%s3677_s5 + $0x4] ss:$0 sm:$0xff] }
 0x13d   :  { %v75_v32 = vadd.f32 %v2438_v29, %v68_v30  ;;  %v2443_v30 = vld [vmem:[%s3677_s5 + $0x5] ss:$0 sm:$0xff] }
 0x13f   :  { %v77_v33 = vpack.c.bf16 %v75_v32, %v74_v31 }
 0x141   :  { %2607 = vmatmul.mubr.msk.bf16.vlgmr.msra.gmra.mrb[0].mxu0 %vm34_vm0, %v77_v33 }
 0x142   :  { %2622 = vmatprep.mubr.msk.bf16.mxu0 %vm3006_vm2, %v3005_v15 }
 0x214   :  { %v124_v35 = vpop.f32.mrb[0].mxu0 }
 0x215   :  { %v125_v36 = vadd.f32 %v2439_v34, %v124_v35  ;;  %v2608_v37 = vpop.f32.mrb[1].mxu0 }
 0x216   :  { %v127_v38 = vpop.f32.mrb[2].mxu0 }
 0x217   :  { %v133_v39 = vmul.f32 0.044715, %v125_v36  ;;  %v128_v40 = vadd.f32 %v2439_v34, %v127_v38  ;;  %v2609_v41 = vpop.f32.mrb[3].mxu0  ;;  %v131_v52 = vmul.f32 0.5, %v125_v36 }
 0x219   :  { %v134_v42 = vmul.f32 0.044715, %v128_v40  ;;  %v135_v43 = vmul.f32 %v133_v39, %v125_v36  ;;  %v132_v56 = vmul.f32 0.5, %v128_v40 }
 0x21b   :  { %v137_v44 = vmul.f32 %v135_v43, %v125_v36  ;;  %v136_v45 = vmul.f32 %v134_v42, %v128_v40 }
 0x21d   :  { %v139_v46 = vadd.f32 %v137_v44, %v125_v36  ;;  %v138_v47 = vmul.f32 %v136_v45, %v128_v40 }
 0x21f   :  { %v141_v48 = vmul.f32 0.7978846, %v139_v46  ;;  %v140_v49 = vadd.f32 %v138_v47, %v128_v40 }
 0x221   :  { %2877 = vtanh.f32 %v141_v48  ;;  %v142_v50 = vmul.f32 0.7978846, %v140_v49 }
 0x223   :  { %2879 = vtanh.f32 %v142_v50 }
 0x22b   :  { %v2878_v51 = vpop.eup %2877 }
 0x22c   :  { %v145_v53 = vadd.f32 1.0, %v2878_v51 }
 0x22d   :  { %v2880_v54 = vpop.eup %2879 }
 0x22e   :  { %v147_v55 = vmul.f32 %v145_v53, %v131_v52  ;;  %v146_v57 = vadd.f32 1.0, %v2880_v54 }
 0x230   :  { %v150_v58 = vsel %vm149_vm3, %v147_v55, 0.0  ;;  %v148_v59 = vmul.f32 %v146_v57, %v132_v56 }
 0x231   :  { %151 = vadd.xlane.f32.xlu0 %v150_v58 }
 0x232   :  { %v153_v60 = vsel %vm149_vm3, %v148_v59, 0.0 }
 0x233   :  { %154 = vadd.xlane.f32.xlu1 %v153_v60 }
 0x2be   :  { %v152_v61 = vpop.xlane.xlu0 %151 }
 0x2bf   :  { %v157_v62 = vmul.f32 0.03125, %v152_v61  ;;  %v2845_v61 = vld [vmem:[%s3676_s4 + $0x14] sm:$0xff]  }
 0x2c0   :  { %v155_v63 = vpop.xlane.xlu1 %154  ;;  %2619 = vmatpush3.bf16.msra.mxu0 %v2845_v61 }
 0x2c1   :  { %v159_v0 = vsub.f32 %v147_v55, %v157_v62  ;;  %v158_v1 = vmul.f32 0.03125, %v155_v63  ;;  %v2846_v62 = vld [vmem:[%s3676_s4 + $0x1c] sm:$0xff]   ;;  %2620 = vmatprep.subr.bf16.mxu0 %v3005_v15 }
 0x2c2   :  { %v287_v63 = vld [vmem:[%s3673_s1] sm:$0xff] }
 0x2c3   :  { %v160_v2 = vsub.f32 %v148_v59, %v158_v1  ;;  %v161_v3 = vmul.f32 %v159_v0, %v159_v0 }
 0x2c4   :  { %2621 = vmatpush3.bf16.msra.mxu0 %v2846_v62 }
 0x2c5   :  { %v163_v4 = vsel %vm149_vm3, %v161_v3, 0.0  ;;  %v162_v5 = vmul.f32 %v160_v2, %v160_v2  ;;  %2638 = vmatprep.subr.bf16.mxu0 %v3005_v15 }
 0x2c6   :  { %164 = vadd.xlane.f32.xlu0 %v163_v4 }
 0x2c7   :  { %v166_v6 = vsel %vm149_vm3, %v162_v5, 0.0 }
 0x2c8   :  { %167 = vadd.xlane.f32.xlu1 %v166_v6 }
 0x2d9   :  { %282 = vperm.xlu1 %2837, %v29_v10  }
 0x2dc   :  { %277 = vperm.xlu0 %2836, %v28_v9  }
 0x353   :  { %v165_v12 = vpop.xlane.xlu0 %164 }
 0x354   :  { %v169_v13 = vmul.f32 0.03125, %v165_v12  ;;  %v2847_v12 = vld [vmem:[%s3676_s4 + $0x44] sm:$0xff]  }
 0x355   :  { %v168_v14 = vpop.xlane.xlu1 %167 }
 0x356   :  { %v171_v16 = vadd.f32 1e-05, %v169_v13  ;;  %v170_v17 = vmul.f32 0.03125, %v168_v14  ;;  %v2848_v13 = vld [vmem:[%s3676_s4 + $0x4c] sm:$0xff]   ;;  %v2849_v14 = vld [vmem:[%s3676_s4 + $0x24] sm:$0xff]  }
 0x358   :  { %2881 = vrsqrt.f32 %v171_v16  ;;  %v172_v18 = vadd.f32 1e-05, %v170_v17  ;;  %v2850_v16 = vld [vmem:[%s3676_s4 + $0x2c] sm:$0xff]   ;;  %v2851_v17 = vld [vmem:[%s3676_s4 + $0x34] sm:$0xff]  }
 0x359   :  { %v283_v55 = vpop.permute.xlu1 %282 }
 0x35a   :  { %2883 = vrsqrt.f32 %v172_v18  ;;  %v2852_v18 = vld [vmem:[%s3676_s4 + $0x3c] sm:$0xff]  }
 0x35b   :  { %v278_v51 = vpop.permute.xlu0 %277 }
 0x362   :  { %v2882_v19 = vpop.eup %2881 }
 0x363   :  { %v175_v21 = vmul.f32 %v2882_v19, %v159_v0  ;;  %v288_v0 = vld [vmem:[%s3673_s1 + $0x8] sm:$0xff]  ;;  %v2447_v19 = vld [vmem:[%s3677_s5 + $0x6] ss:$0 sm:$0xff] }
 0x364   :  { %v2884_v22 = vpop.eup %2883  ;;  %v293_v1 = vpack.c.bf16 %v288_v0, %v287_v63  ;;  %v2459_v0 = vld [vmem:[%s3677_s5 + $0xa] ss:$0 sm:$0xff] }
 0x365   :  { %v176_v23 = vmul.f32 %v2884_v22, %v160_v2  ;;  %v182_v24 = vmul.f32 %v2441_v20, %v175_v21 }
 0x366   :  { %2623 = vmatmul.mubr.msk.bf16.vlgmr.msra.gmra.mrb[4].mxu0 %vm149_vm3, %v293_v1 }
 0x367   :  { %v183_v26 = vmul.f32 %v2441_v20, %v176_v23  ;;  %v189_v27 = vadd.f32 %v2442_v25, %v182_v24  ;;  %2642 = vmatprep.mubr.msk.bf16.mxu0 %vm3006_vm2, %v3005_v15  ;;  %2639 = vmatpush3.bf16.msra.mxu0 %v2847_v12 }
 0x368   :  { %2640 = vmatprep.subr.bf16.mxu0 %v3005_v15 }
 0x369   :  { %v190_v28 = vadd.f32 %v2442_v25, %v183_v26 }
 0x36b   :  { %v195_v29 = vpack.c.bf16 %v190_v28, %v189_v27  ;;  %2641 = vmatpush3.bf16.msra.mxu0 %v2848_v13 }
 0x36c   :  { %2646 = vmatprep.subr.bf16.mxu0 %v3005_v15 }
 0x36d   :  { %2615 = vmatmul.mubr.msk.bf16.vlgmr.msra.gmra.mrb[0].mxu1 %vm149_vm3, %v195_v29 }
 0x36e   :  { %2634 = vmatprep.mubr.msk.bf16.mxu1 %vm3006_vm2, %v3005_v15  ;;  %2627 = vmatpush3.bf16.msra.mxu1 %v2849_v14 }
 0x36f   :  { %2628 = vmatprep.subr.bf16.mxu1 %v3005_v15 }
 0x372   :  { %2629 = vmatpush3.bf16.msra.mxu1 %v2850_v16 }
 0x373   :  { %2630 = vmatprep.subr.bf16.mxu1 %v3005_v15 }
 0x376   :  { %2631 = vmatpush3.bf16.msra.mxu1 %v2851_v17 }
 0x377   :  { %2632 = vmatprep.subr.bf16.mxu1 %v3005_v15 }
 0x37a   :  { %2633 = vmatpush3.bf16.msra.mxu1 %v2852_v18  ;;  %v458_v18 = vlaneseq }
 0x37b   :  { %2652 = vmatprep.subr.bf16.mxu1 %v3005_v15 }
 0x439   :  { %v348_v20 = vpop.f32.mrb[4].mxu0 }
 0x43a   :  { %v349_v21 = vadd.f32 %v2447_v19, %v348_v20  ;;  %v2624_v22 = vpop.f32.mrb[5].mxu0 }
 0x43b   :  { %v351_v23 = vpop.f32.mrb[6].mxu0  ;;  %v3233_v22 = vld [vmem:[%s3675_s3] sm:$0x1] }
 0x43c   :  { %v357_v24 = vmul.f32 0.044715, %v349_v21  ;;  %v352_v25 = vadd.f32 %v2447_v19, %v351_v23  ;;  %v2625_v26 = vpop.f32.mrb[7].mxu0  ;;  %v3222_v19 = vshrl.u32 %v458_v18, 7  ;;  %v3238_v23 = vld [vmem:[%s3675_s3 + $0x1] sm:$0x1] }
 0x43d   :  { %s3009_s3 = smov 64  }
 0x43e   :  { %v359_v27 = vmul.f32 %v357_v24, %v349_v21  ;;  %v358_v28 = vmul.f32 0.044715, %v352_v25  ;;  %v3225_v20 = vsub.s32 0, %v3222_v19 }
 0x440   :  { %v250_v31 = vpop.f32.mrb[0].mxu1  ;;  %v361_v29 = vmul.f32 %v359_v27, %v349_v21  ;;  %v465_v27 = vrot.slane %v3238_v23, %v3225_v20 }
 0x441   :  { %v251_v32 = vadd.f32 %v2443_v30, %v250_v31  ;;  %v2616_v33 = vpop.f32.mrb[1].mxu1 }
 0x442   :  { %v253_v34 = vpop.f32.mrb[2].mxu1  ;;  %v363_v31 = vadd.f32 %v361_v29, %v349_v21 }
 0x443   :  { %v259_v35 = vmul.f32 0.044715, %v251_v32  ;;  %v254_v36 = vadd.f32 %v2443_v30, %v253_v34  ;;  %v2617_v37 = vpop.f32.mrb[3].mxu1  ;;  %v257_v48 = vmul.f32 0.5, %v251_v32  ;;  %v360_v30 = vmul.f32 %v358_v28, %v352_v25 }
 0x444   :  { %v365_v33 = vmul.f32 0.7978846, %v363_v31 }
 0x445   :  { %v260_v38 = vmul.f32 0.044715, %v254_v36  ;;  %v261_v39 = vmul.f32 %v259_v35, %v251_v32  ;;  %v258_v53 = vmul.f32 0.5, %v254_v36 }
 0x447   :  { %v263_v40 = vmul.f32 %v261_v39, %v251_v32  ;;  %v262_v41 = vmul.f32 %v260_v38, %v254_v36  ;;  %v356_v38 = vmul.f32 0.5, %v352_v25 }
 0x449   :  { %v265_v42 = vadd.f32 %v263_v40, %v251_v32  ;;  %v264_v43 = vmul.f32 %v262_v41, %v254_v36  ;;  %v362_v32 = vmul.f32 %v360_v30, %v352_v25 }
 0x44b   :  { %v267_v44 = vmul.f32 0.7978846, %v265_v42  ;;  %v266_v45 = vadd.f32 %v264_v43, %v254_v36  ;;  %v364_v34 = vadd.f32 %v362_v32, %v352_v25  ;;  %v355_v36 = vmul.f32 0.5, %v349_v21  ;;  %v2451_v21 = vld [vmem:[%s3677_s5 + $0x7] ss:$0 sm:$0xff] }
 0x44c   :  { %v461_v25 = vrot.slane %v3233_v22, %v3225_v20 }
 0x44d   :  { %2885 = vtanh.f32 %v267_v44  ;;  %v268_v46 = vmul.f32 0.7978846, %v266_v45  ;;  %v366_v35 = vmul.f32 0.7978846, %v364_v34 }
 0x44f   :  { %2887 = vtanh.f32 %v268_v46 }
 0x450   :  { %2889 = vtanh.f32 %v365_v33 }
 0x451   :  { %2891 = vtanh.f32 %v366_v35 }
 0x457   :  { %v2886_v47 = vpop.eup %2885 }
 0x458   :  { %v271_v49 = vadd.f32 1.0, %v2886_v47 }
 0x459   :  { %v2888_v50 = vpop.eup %2887 }
 0x45a   :  { %v273_v52 = vmul.f32 %v271_v49, %v257_v48  ;;  %v272_v54 = vadd.f32 1.0, %v2888_v50  ;;  %v2890_v37 = vpop.eup %2889 }
 0x45b   :  { %v369_v39 = vadd.f32 1.0, %v2890_v37  ;;  %v2892_v40 = vpop.eup %2891 }
 0x45c   :  { %v3121_v56 = vmul.f32 %v278_v51, %v273_v52  ;;  %v274_v57 = vmul.f32 %v272_v54, %v258_v53  ;;  %v370_v41 = vadd.f32 1.0, %v2892_v40  ;;  %v2457_v53 = vld [vmem:[%s3677_s5 + $0x8] ss:$0 sm:$0xff] }
 0x45d   :  { %v371_v42 = vmul.f32 %v369_v39, %v355_v36 }
 0x45e   :  { %v3123_v58 = vmul.f32 %v283_v55, %v274_v57  ;;  %v478_v59 = vsel %vm149_vm3, %v3121_v56, 0.0  ;;  %v372_v43 = vmul.f32 %v370_v41, %v356_v38 }
 0x45f   :  { %479 = vadd.xlane.f32.xlu1 %v478_v59  ;;  %v2458_v59 = vld [vmem:[%s3677_s5 + $0x9] ss:$0 sm:$0xff] }
 0x460   :  { %v481_v60 = vsel %vm149_vm3, %v3123_v58, 0.0  ;;  %v381_v44 = vpack.c.bf16 %v372_v43, %v371_v42 }
 0x461   :  { %482 = vadd.xlane.f32.xlu0 %v481_v60 }
 0x462   :  { %2635 = vmatmul.mubr.msk.bf16.vlgmr.msra.gmra.mrb[4].mxu1 %vm411_vm4, %v381_v44 }
 0x463   :  { %2654 = vmatprep.mubr.msk.bf16.mxu1 %vm3006_vm2, %v3005_v15 }
 0x4ec   :  { %v480_v2 = vpop.xlane.xlu1 %479 }
 0x4ed   :  { %v484_v3 = vmul.f32 0.03125, %v480_v2 }
 0x4ee   :  { %v483_v4 = vpop.xlane.xlu0 %482 }
 0x4ef   :  { %v3147_v5 = vsub.f32 %v3121_v56, %v484_v3  ;;  %v485_v6 = vmul.f32 0.03125, %v483_v4 }
 0x4f1   :  { %v3150_v7 = vsub.f32 %v3123_v58, %v485_v6  ;;  %v488_v8 = vmul.f32 %v3147_v5, %v3147_v5 }
 0x4f3   :  { %v490_v9 = vsel %vm149_vm3, %v488_v8, 0.0  ;;  %v489_v10 = vmul.f32 %v3150_v7, %v3150_v7 }
 0x4f4   :  { %491 = vadd.xlane.f32.xlu1 %v490_v9 }
 0x4f5   :  { %v493_v11 = vsel %vm149_vm3, %v489_v10, 0.0 }
 0x4f8   :  { %494 = vadd.xlane.f32.xlu1 %v493_v11 }
 0x581   :  { %v492_v45 = vpop.xlane.xlu1 %491 }
 0x582   :  { %v496_v46 = vmul.f32 0.03125, %v492_v45 }
 0x584   :  { %v498_v47 = vadd.f32 1e-05, %v496_v46 }
 0x585   :  { %v495_v48 = vpop.xlane.xlu1 %494 }
 0x586   :  { %2893 = vrsqrt.f32 %v498_v47  ;;  %v497_v49 = vmul.f32 0.03125, %v495_v48 }
 0x588   :  { %v499_v50 = vadd.f32 1e-05, %v497_v49 }
 0x58a   :  { %2895 = vrsqrt.f32 %v499_v50 }
 0x590   :  { %v2894_v51 = vpop.eup %2893 }
 0x591   :  { %v502_v52 = vmul.f32 %v2894_v51, %v3147_v5  ;;  %v449_v5 = vpop.f32.mrb[4].mxu1 }
 0x592   :  { %v2636_v9 = vpop.f32.mrb[5].mxu1  ;;  %v3240_v24 = vadd.f32 %v2451_v21, %v449_v5 }
 0x593   :  { %v509_v55 = vmul.f32 %v2457_v53, %v502_v52  ;;  %v452_v10 = vpop.f32.mrb[6].mxu1 }
 0x594   :  { %v2896_v54 = vpop.eup %2895  ;;  %v2637_v12 = vpop.f32.mrb[7].mxu1  ;;  %v453_v26 = vadd.f32 %v2451_v21, %v452_v10  ;;  %v468_v28 = vadd.f32 %v461_v25, %v3240_v24 }
 0x595   :  { %v503_v57 = vmul.f32 %v2896_v54, %v3150_v7  ;;  %v516_v61 = vadd.f32 %v2458_v59, %v509_v55 }
 0x596   :  { %v469_v32 = vadd.f32 %v465_v27, %v453_v26 }
 0x597   :  { %v510_v60 = vmul.f32 %v2457_v53, %v503_v57 }
 0x599   :  { %v517_v62 = vadd.f32 %v2458_v59, %v510_v60 }
 0x59b   :  { %v522_v63 = vpack.c.bf16 %v517_v62, %v516_v61 }
 0x59d   :  { %2643 = vmatmul.mubr.msk.bf16.vlgmr.msra.gmra.mrb[8].mxu0 %vm149_vm3, %v522_v63 }
 0x59e   :  { %2648 = vmatprep.mubr.msk.bf16.mxu0 %vm3006_vm2, %v3005_v15 }
 0x670   :  { %v577_v1 = vpop.f32.mrb[8].mxu0 }
 0x671   :  { %v578_v2 = vadd.f32 %v2459_v0, %v577_v1  ;;  %v2644_v3 = vpop.f32.mrb[9].mxu0 }
 0x672   :  { %v580_v4 = vpop.f32.mrb[10].mxu0 }
 0x673   :  { %v3202_v6 = vpack.c.bf16 %v578_v2, %v578_v2  ;;  %v581_v7 = vadd.f32 %v2459_v0, %v580_v4  ;;  %v2645_v8 = vpop.f32.mrb[11].mxu0 }
 0x675   :  { %v3204_v11 = vpack.c.bf16 %v581_v7, %v581_v7  ;;  %587 = vrot.lane.b32.xlu1 %v3202_v6, %s3008_s27 }
 0x677   :  { %637 = vrot.lane.b32.xlu0 %v3204_v11, %s3008_s27 }
 0x6e7   :  { %v588_v13 = vpop.permute.xlu1 %587 }
 0x6e8   :  { %v594_v14 = vsel %vm589_vm5, %v588_v13, 0 }
 0x6e9   :  { %2647 = vmatpush3.bf16.xpose.msra.mxu0 %v594_v14  ;;  %v638_v16 = vpop.permute.xlu0 %637 }
 0x6ea   :  { %v643_v17 = vsel %vm589_vm5, %v638_v16, 0  ;;  %2658 = vmatprep.subr.bf16.mxu0 %v3005_v15 }
 0x6eb   :  { %2653 = vmatpush3.bf16.xpose.msra.mxu1 %v643_v17 }
 0x6ec   :  { %2664 = vmatprep.subr.bf16.mxu1 %v3005_v15 }
 0x6f0   :  { %2649 = vmatmul.mubr.msk.bf16.vlgmr.msra.gmra.mrb[12].mxu0 %vm589_vm5, %v3202_v6 }
 0x6f1   :  { %2660 = vmatprep.mubr.msk.bf16.mxu0 %vm3006_vm2, %v3005_v15 }
 0x6f2   :  { %2655 = vmatmul.mubr.msk.bf16.vlgmr.msra.gmra.mrb[8].mxu1 %vm589_vm5, %v3204_v11 }
 0x6f3   :  { %2666 = vmatprep.mubr.msk.bf16.mxu1 %vm3006_vm2, %v3005_v15 }
 0x7c3   :  { %v630_v29 = vpop.f32.mrb[12].mxu0 }
 0x7c4   :  { %v631_v30 = vadd.f32 %v630_v29, %v468_v28  ;;  %v2650_v31 = vpop.f32.mrb[13].mxu0 }
 0x7c5   :  { %v633_v33 = vpop.f32.mrb[14].mxu0  ;;  %v679_v34 = vpop.f32.mrb[8].mxu1 }
 0x7c6   :  { %v680_v35 = vadd.f32 %v679_v34, %v469_v32  ;;  %v2651_v36 = vpop.f32.mrb[15].mxu0  ;;  %v2656_v37 = vpop.f32.mrb[9].mxu1  ;;  %v686_v38 = vsel %vm685_vm6, %v631_v30, -inf }
 0x7c7   :  { %v682_v39 = vpop.f32.mrb[10].mxu1  ;;  %687 = vmax.xlane.f32.xlu1 %v686_v38 }
 0x7c8   :  { %v2657_v40 = vpop.f32.mrb[11].mxu1  ;;  %v689_v41 = vsel %vm685_vm6, %v680_v35, -inf }
 0x7c9   :  { %690 = vmax.xlane.f32.xlu0 %v689_v41 }
 0x7d8   :  { %710 = vrot.lane.b32.xlu1 %v3202_v6, %s3009_s3 }
 0x7dc   :  { %809 = vrot.lane.b32.xlu1 %v3202_v6, %s3010_s9 }
 0x7df   :  { %759 = vrot.lane.b32.xlu0 %v3204_v11, %s3009_s3 }
 0x7e3   :  { %861 = vrot.lane.b32.xlu0 %v3204_v11, %s3011_s10 }
 0x7e7   :  { %472 = vrot.lane.b32.xlu0 %v465_v27, %s3012_s11 }
 0x854   :  { %v688_v42 = vpop.xlane.xlu1 %687 }
 0x855   :  { %v692_v43 = vsub.f32 %v631_v30, %v688_v42 }
 0x856   :  { %v691_v44 = vpop.xlane.xlu0 %690 }
 0x857   :  { %v694_v45 = vmul.f32 1.442695, %v692_v43  ;;  %v693_v46 = vsub.f32 %v680_v35, %v691_v44 }
 0x858   :  { %v711_v47 = vpop.permute.xlu1 %710 }
 0x859   :  { %2897 = vpow2.f32 %v694_v45  ;;  %v696_v48 = vmul.f32 1.442695, %v693_v46  ;;  %v717_v49 = vsel %vm715_vm7, %v711_v47, 0 }
 0x85a   :  { %v760_v50 = vpop.permute.xlu0 %759  ;;  %2659 = vmatpush3.bf16.msra.mxu0 %v717_v49 }
 0x85b   :  { %2899 = vpow2.f32 %v696_v48  ;;  %v765_v51 = vsel %vm715_vm7, %v760_v50, 0  ;;  %2670 = vmatprep.subr.bf16.mxu0 %v3005_v15 }
 0x85c   :  { %2665 = vmatpush3.bf16.msra.mxu1 %v765_v51  ;;  %v810_v61 = vpop.permute.xlu1 %809 }
 0x85d   :  { %2676 = vmatprep.subr.bf16.mxu1 %v3005_v15  ;;  %v819_v7 = vsel %vm589_vm5, %v810_v61, 0 }
 0x85e   :  { %v862_v52 = vpop.permute.xlu0 %861 }
 0x862   :  { %v473_v53 = vpop.permute.xlu0 %472 }
 0x863   :  { %v2898_v54 = vpop.eup %2897  ;;  %v477_v55 = vadd.f32 %v473_v53, %v453_v26 }
 0x864   :  { %v698_v57 = vsel %vm685_vm6, %v2898_v54, 0.0 }
 0x865   :  { %v2900_v59 = vpop.eup %2899  ;;  %866 = vrot.lane.b32.xlu0 %v477_v55, %s3013_s12  ;;  %699 = vadd.xlane.f32.xlu1 %v698_v57 }
 0x866   :  { %v701_v60 = vsel %vm685_vm6, %v2900_v59, 0.0 }
 0x869   :  { %702 = vadd.xlane.f32.xlu1 %v701_v60 }
 0x87a   :  { %863 = vrot.lane.b32.xlu1 %v3204_v11, %s3010_s9 }
 0x87e   :  { %807 = vrot.lane.b32.xlu1 %v3202_v6, %s3011_s10 }
 0x882   :  { %470 = vrot.lane.b32.xlu1 %v461_v25, %s3012_s11 }
 0x8d7   :  { %v867_v34 = vpop.permute.xlu0 %866 }
 0x8f2   :  { %v700_v62 = vpop.xlane.xlu1 %699 }
 0x8f3   :  { %2901 = vrcp.f32 %v700_v62 }
 0x8f6   :  { %v703_v63 = vpop.xlane.xlu1 %702 }
 0x8f7   :  { %2903 = vrcp.f32 %v703_v63  ;;  %v2853_v63 = vld [vmem:[%s3676_s4 + $0x54] sm:$0xff]  }
 0x8fa   :  { %v864_v0 = vpop.permute.xlu1 %863 }
 0x8fb   :  { %v873_v13 = vsel %vm589_vm5, %v864_v0, 0  ;;  %v2854_v0 = vld [vmem:[%s3676_s4 + $0x5c] sm:$0xff]  }
 0x8fd   :  { %v2902_v1 = vpop.eup %2901 }
 0x8fe   :  { %v706_v2 = vmul.f32 %v2902_v1, %v2898_v54  ;;  %v808_v3 = vpop.permute.xlu1 %807 }
 0x900   :  { %v708_v4 = vpack.c.bf16 %v706_v2, %v706_v2 }
 0x901   :  { %v2904_v5 = vpop.eup %2903 }
 0x902   :  { %v707_v8 = vmul.f32 %v2904_v5, %v2900_v59  ;;  %2661 = vmatmul.mubr.msk.bf16.vlgmr.msra.gmra.mrb[16].mxu0 %vm685_vm6, %v708_v4  ;;  %v471_v9 = vpop.permute.xlu1 %470 }
 0x903   :  { %2671 = vmatpush3.bf16.xpose.msra.mxu0 %v819_v7  ;;  %v476_v10 = vadd.f32 %v471_v9, %v3240_v24  ;;  %2672 = vmatprep.mubr.msk.bf16.mxu0 %vm3006_vm2, %v3005_v15 }
 0x904   :  { %v709_v12 = vpack.c.bf16 %v707_v8, %v707_v8  ;;  %2682 = vmatprep.subr.bf16.mxu0 %v3005_v15 }
 0x905   :  { %812 = vrot.lane.b32.xlu1 %v476_v10, %s3013_s12 }
 0x906   :  { %2667 = vmatmul.mubr.msk.bf16.vlgmr.msra.gmra.mrb[12].mxu1 %vm685_vm6, %v709_v12 }
 0x907   :  { %2677 = vmatpush3.bf16.xpose.msra.mxu1 %v873_v13  ;;  %2678 = vmatprep.mubr.msk.bf16.mxu1 %vm3006_vm2, %v3005_v15 }
 0x908   :  { %2688 = vmatprep.subr.bf16.mxu1 %v3005_v15 }
 0x90a   :  { %2673 = vmatmul.mubr.msk.bf16.vlgmr.msra.gmra.mrb[20].mxu0 %vm589_vm5, %v808_v3 }
 0x90b   :  { %2684 = vmatprep.mubr.msk.bf16.mxu0 %vm3006_vm2, %v3005_v15 }
 0x90e   :  { %2679 = vmatmul.mubr.msk.bf16.vlgmr.msra.gmra.mrb[16].mxu1 %vm589_vm5, %v862_v52 }
 0x90f   :  { %2690 = vmatprep.mubr.msk.bf16.mxu1 %vm3006_vm2, %v3005_v15 }
 0x977   :  { %v813_v27 = vpop.permute.xlu1 %812 }
 0x9d5   :  { %v3286_v14 = vpop.f32.mrb[16].mxu0 }
 0x9d6   :  { %v2662_v16 = vpop.f32.mrb[17].mxu0 }
 0x9d7   :  { %v756_v17 = vpop.f32.mrb[18].mxu0 }
 0x9d8   :  { %v2663_v18 = vpop.f32.mrb[19].mxu0 }
 0x9d9   :  { %v3288_v21 = vpop.f32.mrb[12].mxu1 }
 0x9da   :  { %v2668_v24 = vpop.f32.mrb[13].mxu1 }
 0x9db   :  { %v804_v25 = vpop.f32.mrb[14].mxu1 }
 0x9dc   :  { %v2669_v26 = vpop.f32.mrb[15].mxu1 }
 0x9dd   :  { %v855_v28 = vpop.f32.mrb[20].mxu0  ;;  %v2474_v26 = vld [vmem:[%s3677_s5 + $0xb] ss:$0 sm:$0xff] }
 0x9de   :  { %v856_v29 = vadd.f32 %v855_v28, %v813_v27  ;;  %v2674_v30 = vpop.f32.mrb[21].mxu0 }
 0x9df   :  { %v858_v31 = vpop.f32.mrb[22].mxu0 }
 0x9e0   :  { %v2675_v32 = vpop.f32.mrb[23].mxu0  ;;  %v915_v33 = vsel %vm685_vm6, %v856_v29, -inf }
 0x9e1   :  { %v909_v35 = vpop.f32.mrb[16].mxu1  ;;  %916 = vmax.xlane.f32.xlu1 %v915_v33 }
 0x9e2   :  { %v910_v36 = vadd.f32 %v909_v35, %v867_v34  ;;  %v2680_v37 = vpop.f32.mrb[17].mxu1 }
 0x9e3   :  { %v912_v38 = vpop.f32.mrb[18].mxu1 }
 0x9e4   :  { %v2681_v39 = vpop.f32.mrb[19].mxu1  ;;  %v918_v40 = vsel %vm685_vm6, %v910_v36, -inf }
 0x9e5   :  { %919 = vmax.xlane.f32.xlu0 %v918_v40 }
 0xa6e   :  { %v917_v41 = vpop.xlane.xlu1 %916 }
 0xa6f   :  { %v921_v42 = vsub.f32 %v856_v29, %v917_v41 }
 0xa71   :  { %v923_v43 = vmul.f32 1.442695, %v921_v42  ;;  %v2855_v42 = vld [vmem:[%s3676_s4 + $0x64] sm:$0xff]  }
 0xa72   :  { %v920_v44 = vpop.xlane.xlu0 %919 }
 0xa73   :  { %2905 = vpow2.f32 %v923_v43  ;;  %v922_v45 = vsub.f32 %v910_v36, %v920_v44  ;;  %v2856_v43 = vld [vmem:[%s3676_s4 + $0x6c] sm:$0xff]  }
 0xa75   :  { %v925_v46 = vmul.f32 1.442695, %v922_v45 }
 0xa77   :  { %2907 = vpow2.f32 %v925_v46 }
 0xa7d   :  { %v2906_v47 = vpop.eup %2905 }
 0xa7e   :  { %v927_v48 = vsel %vm685_vm6, %v2906_v47, 0.0 }
 0xa7f   :  { %928 = vadd.xlane.f32.xlu0 %v927_v48 }
 0xa81   :  { %v2908_v49 = vpop.eup %2907 }
 0xa82   :  { %v930_v50 = vsel %vm685_vm6, %v2908_v49, 0.0 }
 0xa83   :  { %931 = vadd.xlane.f32.xlu1 %v930_v50 }
 0xa94   :  { %987 = vrot.lane.b32.xlu1 %v3204_v11, %s3014_s13 }
 0xa95   :  { %939 = vrot.lane.b32.xlu0 %v3202_v6, %s3014_s13 }
 0xb0c   :  { %v929_v51 = vpop.xlane.xlu0 %928 }
 0xb0d   :  { %2909 = vrcp.f32 %v929_v51 }
 0xb10   :  { %v940_v52 = vpop.permute.xlu0 %939  ;;  %v932_v53 = vpop.xlane.xlu1 %931 }
 0xb11   :  { %v945_v54 = vsel %vm715_vm7, %v940_v52, 0  ;;  %2911 = vrcp.f32 %v932_v53  ;;  %v2475_v52 = vld [vmem:[%s3677_s5 + $0xc] ss:$0 sm:$0xff] }
 0xb12   :  { %2683 = vmatpush3.bf16.msra.mxu0 %v945_v54 }
 0xb13   :  { %2694 = vmatprep.subr.bf16.mxu0 %v3005_v15 }
 0xb14   :  { %v988_v55 = vpop.permute.xlu1 %987 }
 0xb15   :  { %v993_v57 = vsel %vm715_vm7, %v988_v55, 0 }
 0xb16   :  { %2689 = vmatpush3.bf16.msra.mxu1 %v993_v57  ;;  %v2476_v57 = vld [vmem:[%s3677_s5 + $0xd] ss:$0 sm:$0xff] }
 0xb17   :  { %v2910_v59 = vpop.eup %2909  ;;  %2702 = vmatprep.subr.bf16.mxu1 %v3005_v15 }
 0xb18   :  { %v935_v11 = vmul.f32 %v2910_v59, %v2906_v47 }
 0xb1a   :  { %v937_v60 = vpack.c.bf16 %v935_v11, %v935_v11 }
 0xb1b   :  { %v2912_v6 = vpop.eup %2911 }
 0xb1c   :  { %v936_v61 = vmul.f32 %v2912_v6, %v2908_v49  ;;  %2685 = vmatmul.mubr.msk.bf16.vlgmr.msra.gmra.mrb[24].mxu0 %vm685_vm6, %v937_v60 }
 0xb1d   :  { %2698 = vmatprep.mubr.msk.bf16.mxu0 %vm3006_vm2, %v3005_v15  ;;  %2695 = vmatpush3.bf16.msra.mxu0 %v2853_v63  ;;  %v2859_v63 = vld [vmem:[%s3676_s4 + $0x84] sm:$0xff]  }
 0xb1e   :  { %v938_v62 = vpack.c.bf16 %v936_v61, %v936_v61  ;;  %2696 = vmatprep.subr.bf16.mxu0 %v3005_v15  ;;  %v2857_v61 = vld [vmem:[%s3676_s4 + $0x74] sm:$0xff]  }
 0xb20   :  { %2691 = vmatmul.mubr.msk.bf16.vlgmr.msra.gmra.mrb[20].mxu1 %vm685_vm6, %v938_v62  ;;  %v2858_v62 = vld [vmem:[%s3676_s4 + $0x7c] sm:$0xff]  }
 0xb21   :  { %2706 = vmatprep.mubr.msk.bf16.mxu1 %vm3006_vm2, %v3005_v15  ;;  %2697 = vmatpush3.bf16.msra.mxu0 %v2854_v0  ;;  %v2860_v0 = vld [vmem:[%s3676_s4 + $0x8c] sm:$0xff]  }
 0xb22   :  { %2710 = vmatprep.subr.bf16.mxu0 %v3005_v15  ;;  %2703 = vmatpush3.bf16.msra.mxu1 %v2855_v42 }
 0xb23   :  { %2704 = vmatprep.subr.bf16.mxu1 %v3005_v15 }
 0xb26   :  { %2705 = vmatpush3.bf16.msra.mxu1 %v2856_v43 }
 0xb27   :  { %2722 = vmatprep.subr.bf16.mxu1 %v3005_v15 }
 0xbef   :  { %v981_v1 = vpop.f32.mrb[24].mxu0 }
 0xbf0   :  { %v2686_v2 = vpop.f32.mrb[25].mxu0 }
 0xbf1   :  { %v984_v3 = vpop.f32.mrb[26].mxu0 }
 0xbf2   :  { %v2687_v4 = vpop.f32.mrb[27].mxu0  ;;  %v2477_v3 = vld [vmem:[%s3677_s5 + $0xe] ss:$0 sm:$0xff] }
 0xbf3   :  { %v1029_v5 = vpop.f32.mrb[20].mxu1 }
 0xbf4   :  { %v2838_v7 = vpack.i.bf16 %v1029_v5, %v981_v1  ;;  %v2692_v8 = vpop.f32.mrb[21].mxu1  ;;  %v3377_v1 = vld [vmem:[%s3677_s5 + $0x18] ss:$0 sm:$0xff] }
 0xbf5   :  { %v1032_v9 = vpop.f32.mrb[22].mxu1  ;;  %v1368_v2 = vsel %vm149_vm3, %v3377_v1, 0.0 }
 0xbf6   :  { %v2693_v10 = vpop.f32.mrb[23].mxu1  ;;  %2839 = vrot.lane.b32.xlu1 %v2838_v7, %s3015_s18 }
 0xc68   :  { %v2840_v12 = vpop.permute.xlu1 %2839 }
 0xc69   :  { %v2842_v13 = vunpack.i.h.bf16 %v2840_v12  ;;  %v2841_v16 = vunpack.i.l.bf16 %v2840_v12 }
 0xc6b   :  { %v1044_v17 = vsel %vm589_vm5, %v3288_v21, %v2842_v13  ;;  %v1043_v18 = vsel %vm589_vm5, %v3286_v14, %v2841_v16 }
 0xc6c   :  { %v1049_v24 = vpack.c.bf16 %v1044_v17, %v1043_v18 }
 0xc6e   :  { %2699 = vmatmul.mubr.msk.bf16.vlgmr.msra.gmra.mrb[28].mxu0 %vm149_vm3, %v1049_v24 }
 0xc6f   :  { %2718 = vmatprep.mubr.msk.bf16.mxu0 %vm3006_vm2, %v3005_v15  ;;  %2711 = vmatpush3.bf16.msra.mxu0 %v2857_v61 }
 0xc70   :  { %2712 = vmatprep.subr.bf16.mxu0 %v3005_v15 }
 0xc73   :  { %2713 = vmatpush3.bf16.msra.mxu0 %v2858_v62 }
 0xc74   :  { %2714 = vmatprep.subr.bf16.mxu0 %v3005_v15 }
 0xc77   :  { %2715 = vmatpush3.bf16.msra.mxu0 %v2859_v63 }
 0xc78   :  { %2716 = vmatprep.subr.bf16.mxu0 %v3005_v15 }
 0xc7b   :  { %2717 = vmatpush3.bf16.msra.mxu0 %v2860_v0 }
 0xc7c   :  { %2738 = vmatprep.subr.bf16.mxu0 %v3005_v15 }
 0xd41   :  { %v1099_v25 = vpop.f32.mrb[28].mxu0 }
 0xd42   :  { %v1106_v27 = vadd.f32 %v1099_v25, %v3121_v56  ;;  %v2700_v28 = vpop.f32.mrb[29].mxu0 }
 0xd43   :  { %v1102_v29 = vpop.f32.mrb[30].mxu0 }
 0xd44   :  { %v3328_v30 = vadd.f32 %v2474_v26, %v1106_v27  ;;  %v1107_v21 = vadd.f32 %v1102_v29, %v3123_v58  ;;  %v2701_v14 = vpop.f32.mrb[31].mxu0 }
 0xd46   :  { %v3331_v31 = vadd.f32 %v2474_v26, %v1107_v21  ;;  %v1115_v32 = vsel %vm149_vm3, %v3328_v30, 0.0 }
 0xd47   :  { %1116 = vadd.xlane.f32.xlu0 %v1115_v32 }
 0xd48   :  { %v1118_v33 = vsel %vm149_vm3, %v3331_v31, 0.0 }
 0xd49   :  { %1119 = vadd.xlane.f32.xlu1 %v1118_v33 }
 0xd4d   :  { %1369 = vadd.xlane.f32.xlu1 %v1368_v2 }
 0xdd4   :  { %v1117_v34 = vpop.xlane.xlu0 %1116 }
 0xdd5   :  { %v1121_v35 = vmul.f32 0.03125, %v1117_v34 }
 0xdd6   :  { %v1120_v56 = vpop.xlane.xlu1 %1119 }
 0xdd7   :  { %v1123_v36 = vsub.f32 %v3328_v30, %v1121_v35  ;;  %v1122_v37 = vmul.f32 0.03125, %v1120_v56 }
 0xdd9   :  { %v1124_v38 = vsub.f32 %v3331_v31, %v1122_v37  ;;  %v1125_v58 = vmul.f32 %v1123_v36, %v1123_v36 }
 0xdda   :  { %v1370_v37 = vpop.xlane.xlu1 %1369 }
 0xddb   :  { %v1127_v39 = vsel %vm149_vm3, %v1125_v58, 0.0  ;;  %v1126_v40 = vmul.f32 %v1124_v38, %v1124_v38  ;;  %v2481_v58 = vld [vmem:[%s3677_s5 + $0xf] ss:$0 sm:$0xff] }
 0xddc   :  { %1128 = vadd.xlane.f32.xlu0 %v1127_v39 }
 0xddd   :  { %v1130_v41 = vsel %vm149_vm3, %v1126_v40, 0.0 }
 0xde0   :  { %1131 = vadd.xlane.f32.xlu0 %v1130_v41 }
 0xe69   :  { %v1129_v44 = vpop.xlane.xlu0 %1128 }
 0xe6a   :  { %v1133_v45 = vmul.f32 0.03125, %v1129_v44 }
 0xe6c   :  { %v1135_v46 = vadd.f32 1e-05, %v1133_v45 }
 0xe6d   :  { %v1132_v47 = vpop.xlane.xlu0 %1131 }
 0xe6e   :  { %2913 = vrsqrt.f32 %v1135_v46  ;;  %v1134_v48 = vmul.f32 0.03125, %v1132_v47 }
 0xe70   :  { %v1136_v49 = vadd.f32 1e-05, %v1134_v48 }
 0xe72   :  { %2915 = vrsqrt.f32 %v1136_v49 }
 0xe78   :  { %v2914_v50 = vpop.eup %2913 }
 0xe79   :  { %v1139_v51 = vmul.f32 %v2914_v50, %v1123_v36 }
 0xe7b   :  { %v1146_v54 = vmul.f32 %v2475_v52, %v1139_v51 }
 0xe7c   :  { %v2916_v53 = vpop.eup %2915 }
 0xe7d   :  { %v1140_v55 = vmul.f32 %v2916_v53, %v1124_v38  ;;  %v1153_v11 = vadd.f32 %v2476_v57, %v1146_v54  ;;  %v1371_v38 = vmul.f32 0.03125, %v1370_v37 }
 0xe7f   :  { %v1147_v59 = vmul.f32 %v2475_v52, %v1140_v55  ;;  %v1372_v39 = vsub.f32 %v3377_v1, %v1371_v38  ;;  %v2861_v52 = vld [vmem:[%s3676_s4 + $0x94] sm:$0xff]  }
 0xe81   :  { %v1154_v60 = vadd.f32 %v2476_v57, %v1147_v59  ;;  %v1373_v47 = vmul.f32 %v1372_v39, %v1372_v39 }
 0xe83   :  { %v1159_v6 = vpack.c.bf16 %v1154_v60, %v1153_v11  ;;  %v1374_v51 = vsel %vm149_vm3, %v1373_v47, 0.0 }
 0xe85   :  { %2707 = vmatmul.mubr.msk.bf16.vlgmr.msra.gmra.mrb[24].mxu1 %vm149_vm3, %v1159_v6 }
 0xe86   :  { %2726 = vmatprep.mubr.msk.bf16.mxu1 %vm3006_vm2, %v3005_v15  ;;  %2723 = vmatpush3.bf16.msra.mxu1 %v2861_v52 }
 0xe87   :  { %2724 = vmatprep.subr.bf16.mxu1 %v3005_v15 }
 0xf58   :  { %v1214_v4 = vpop.f32.mrb[24].mxu1 }
 0xf59   :  { %v1215_v5 = vadd.f32 %v2477_v3, %v1214_v4  ;;  %v2708_v7 = vpop.f32.mrb[25].mxu1 }
 0xf5a   :  { %v1217_v8 = vpop.f32.mrb[26].mxu1 }
 0xf5b   :  { %v1223_v9 = vmul.f32 0.044715, %v1215_v5  ;;  %v1218_v10 = vadd.f32 %v2477_v3, %v1217_v8  ;;  %v2709_v12 = vpop.f32.mrb[27].mxu1  ;;  %v1221_v32 = vmul.f32 0.5, %v1215_v5  ;;  %v2488_v3 = vld [vmem:[%s3677_s5 + $0x10] ss:$0 sm:$0xff] }
 0xf5d   :  { %v1225_v13 = vmul.f32 %v1223_v9, %v1215_v5  ;;  %v1224_v16 = vmul.f32 0.044715, %v1218_v10  ;;  %v1222_v33 = vmul.f32 0.5, %v1218_v10 }
 0xf5f   :  { %v1227_v17 = vmul.f32 %v1225_v13, %v1215_v5  ;;  %v1226_v18 = vmul.f32 %v1224_v16, %v1218_v10 }
 0xf61   :  { %v1229_v24 = vadd.f32 %v1227_v17, %v1215_v5  ;;  %v1228_v25 = vmul.f32 %v1226_v18, %v1218_v10  ;;  %v2489_v5 = vld [vmem:[%s3677_s5 + $0x11] ss:$0 sm:$0xff] }
 0xf63   :  { %v1231_v26 = vmul.f32 0.7978846, %v1229_v24  ;;  %v1230_v27 = vadd.f32 %v1228_v25, %v1218_v10 }
 0xf65   :  { %2917 = vtanh.f32 %v1231_v26  ;;  %v1232_v28 = vmul.f32 0.7978846, %v1230_v27 }
 0xf67   :  { %2919 = vtanh.f32 %v1232_v28 }
 0xf6f   :  { %v2918_v29 = vpop.eup %2917 }
 0xf70   :  { %v1235_v21 = vadd.f32 1.0, %v2918_v29 }
 0xf71   :  { %v2920_v14 = vpop.eup %2919 }
 0xf72   :  { %v1236_v34 = vadd.f32 1.0, %v2920_v14  ;;  %v1237_v35 = vmul.f32 %v1235_v21, %v1221_v32 }
 0xf74   :  { %v1238_v56 = vmul.f32 %v1236_v34, %v1222_v33 }
 0xf76   :  { %v1247_v36 = vpack.c.bf16 %v1238_v56, %v1237_v35 }
 0xf78   :  { %2719 = vmatmul.mubr.msk.bf16.vlgmr.msra.gmra.mrb[32].mxu0 %vm411_vm4, %v1247_v36  ;;  %v3016_v36 = vmov 1966171168  }
 0xf79   :  { %2740 = vmatprep.mubr.msk.bf16.mxu0 %vm3006_vm2, %v3005_v15  ;;  %v1495_v37 = vunpack.c.l.s4 %v3016_v36 }
 0xf7b   :  { %v1496_v38 = vunpack.c.0.s8 %v1495_v37 }
0x104b   :  { %v1314_v40 = vpop.f32.mrb[32].mxu0 }
0x104c   :  { %v1315_v41 = vadd.f32 %v2481_v58, %v1314_v40  ;;  %v2720_v42 = vpop.f32.mrb[33].mxu0  ;;  %v1499_v40 = vsub.s32 %v1496_v38, %v3222_v19 }
0x104d   :  { %v1317_v43 = vpop.f32.mrb[34].mxu0 }
0x104e   :  { %v1318_v44 = vadd.f32 %v2481_v58, %v1317_v43  ;;  %v2721_v45 = vpop.f32.mrb[35].mxu0  ;;  %v1321_v46 = vadd.f32 %v1315_v41, %v3328_v30  ;;  %v2862_v30 = vld [vmem:[%s3676_s4 + $0x9c] sm:$0xff]   ;;  %v2490_v58 = vld [vmem:[%s3677_s5 + $0x12] ss:$0 sm:$0xff] }
0x104f   :  { %2725 = vmatpush3.bf16.msra.mxu1 %v2862_v30 }
0x1050   :  { %v1328_v48 = vsel %vm149_vm3, %v1321_v46, 0.0  ;;  %v1322_v49 = vadd.f32 %v1318_v44, %v3331_v31  ;;  %2730 = vmatprep.subr.bf16.mxu1 %v3005_v15 }
0x1051   :  { %1329 = vadd.xlane.f32.xlu0 %v1328_v48 }
0x1052   :  { %v1331_v50 = vsel %vm149_vm3, %v1322_v49, 0.0 }
0x1053   :  { %1332 = vadd.xlane.f32.xlu1 %v1331_v50 }
0x1055   :  { %1375 = vadd.xlane.f32.xlu0 %v1374_v51 }
0x10de   :  { %v1330_v31 = vpop.xlane.xlu0 %1329 }
0x10df   :  { %v1334_v53 = vmul.f32 0.03125, %v1330_v31 }
0x10e0   :  { %v1333_v54 = vpop.xlane.xlu1 %1332 }
0x10e1   :  { %v1336_v55 = vsub.f32 %v1321_v46, %v1334_v53  ;;  %v1335_v57 = vmul.f32 0.03125, %v1333_v54 }
0x10e2   :  { %v1376_v59 = vpop.xlane.xlu0 %1375 }
0x10e3   :  { %v1337_v11 = vsub.f32 %v1322_v49, %v1335_v57  ;;  %v1377_v60 = vmul.f32 0.03125, %v1376_v59  ;;  %v1338_v6 = vmul.f32 %v1336_v55, %v1336_v55 }
0x10e5   :  { %v1378_v61 = vadd.f32 1e-05, %v1377_v60  ;;  %v1340_v62 = vsel %vm149_vm3, %v1338_v6, 0.0  ;;  %v1339_v63 = vmul.f32 %v1337_v11, %v1337_v11 }
0x10e6   :  { %1341 = vadd.xlane.f32.xlu1 %v1340_v62 }
0x10e7   :  { %2921 = vrsqrt.f32 %v1378_v61  ;;  %v1343_v0 = vsel %vm149_vm3, %v1339_v63, 0.0 }
0x10e8   :  { %1344 = vadd.xlane.f32.xlu0 %v1343_v0 }
0x10f1   :  { %v2922_v2 = vpop.eup %2921 }
0x10f2   :  { %v1380_v4 = vmul.f32 %v2922_v2, %v1372_v39 }
0x10f4   :  { %v1381_v7 = vmul.f32 %v2488_v3, %v1380_v4 }
0x10f6   :  { %v1382_v8 = vadd.f32 %v2489_v5, %v1381_v7 }
0x10f8   :  { %v1387_v9 = vpack.c.bf16 %v1382_v8, %v1382_v8 }
0x10fa   :  { %2727 = vmatmul.mubr.msk.bf16.vlgmr.msra.gmra.mrb[28].mxu1 %vm149_vm3, %v1387_v9 }
0x10fb   :  { %2731 = vmatpush3.bf16.msra.mxu1 %v2861_v52  ;;  %2734 = vmatprep.mubr.msk.bf16.mxu1 %vm3006_vm2, %v3005_v15 }
0x10fc   :  { %2732 = vmatprep.subr.bf16.mxu1 %v3005_v15 }
0x10ff   :  { %2733 = vmatpush3.bf16.msra.mxu1 %v2862_v30 }
0x1100   :  { %2744 = vmatprep.subr.bf16.mxu1 %v3005_v15 }
0x1173   :  { %v1342_v10 = vpop.xlane.xlu1 %1341 }
0x1174   :  { %v1346_v12 = vmul.f32 0.03125, %v1342_v10 }
0x1175   :  { %v1345_v13 = vpop.xlane.xlu0 %1344 }
0x1176   :  { %v1348_v16 = vadd.f32 1e-05, %v1346_v12  ;;  %v1347_v17 = vmul.f32 0.03125, %v1345_v13 }
0x1178   :  { %2923 = vrsqrt.f32 %v1348_v16  ;;  %v1349_v18 = vadd.f32 1e-05, %v1347_v17 }
0x117a   :  { %2925 = vrsqrt.f32 %v1349_v18 }
0x1182   :  { %v2924_v24 = vpop.eup %2923 }
0x1183   :  { %v1352_v25 = vmul.f32 %v2924_v24, %v1336_v55 }
0x1184   :  { %v2926_v26 = vpop.eup %2925 }
0x1185   :  { %v1359_v27 = vmul.f32 %v2488_v3, %v1352_v25  ;;  %v1353_v28 = vmul.f32 %v2926_v26, %v1337_v11 }
0x1187   :  { %v1360_v29 = vmul.f32 %v2488_v3, %v1353_v28  ;;  %v1366_v21 = vadd.f32 %v2489_v5, %v1359_v27 }
0x1189   :  { %v1367_v14 = vadd.f32 %v2489_v5, %v1360_v29 }
0x118b   :  { %v1448_v32 = vpack.c.bf16 %v1367_v14, %v1366_v21 }
0x118d   :  { %2735 = vmatmul.mubr.msk.bf16.vlgmr.msra.gmra.mrb[32].mxu1 %vm149_vm3, %v1448_v32 }
0x118e   :  { %2746 = vmatprep.mubr.msk.bf16.mxu1 %vm3006_vm2, %v3005_v15 }
0x11cd   :  { %v1442_v33 = vpop.f32.mrb[28].mxu1 }
0x11ce   :  { %v2728_v34 = vpop.f32.mrb[29].mxu1  ;;  %v1443_v39 = vadd.f32 %v2490_v58, %v1442_v33 }
0x11cf   :  { %v1445_v35 = vpop.f32.mrb[30].mxu1 }
0x11d0   :  { %v2729_v56 = vpop.f32.mrb[31].mxu1  ;;  %v1500_v42 = vrot.slane %v1443_v39, %v1499_v40 }
0x11d2   :  { %v1501_v49 = vcombine.high %v1500_v42, %v1500_v42  ;;  %v3436_v19 = vrot.slane %v1500_v42, %v1499_v40 }
0x11d4   :  { %v3432_v51 = vrot.slane %v1501_v49, %v1499_v40  ;;  %v1533_v57 = vpack.c.bf16 %v3436_v19, %v3436_v19 }
0x11d6   :  { %v1534_v11 = vpack.c.bf16 %v3432_v51, %v3432_v51 }
0x1260   :  { %v1486_v41 = vpop.f32.mrb[32].mxu1 }
0x1261   :  { %v1487_v43 = vadd.f32 %v2490_v58, %v1486_v41  ;;  %v2736_v44 = vpop.f32.mrb[33].mxu1 }
0x1262   :  { %v1489_v45 = vpop.f32.mrb[34].mxu1 }
0x1263   :  { %v3424_v46 = vpack.c.bf16 %v1487_v43, %v1487_v43  ;;  %v1490_v47 = vadd.f32 %v2490_v58, %v1489_v45  ;;  %v2737_v48 = vpop.f32.mrb[35].mxu1 }
0x1265   :  { %v3426_v50 = vpack.c.bf16 %v1490_v47, %v1490_v47  ;;  %1538 = vrot.lane.b32.xlu0 %v3424_v46, %s3008_s27 }
0x1267   :  { %1587 = vrot.lane.b32.xlu1 %v3426_v50, %s3008_s27 }
0x126b   :  { %1520 = vrot.lane.b32.xlu1 %v3432_v51, %s3008_s27 }
0x126f   :  { %1518 = vrot.lane.b32.xlu1 %v3436_v19, %s3008_s27 }
0x1273   :  { %1732 = vrot.lane.b32.xlu1 %v3426_v50, %s3009_s3 }
0x1277   :  { %1860 = vrot.lane.b32.xlu1 %v3426_v50, %s3010_s9 }
0x12d7   :  { %v1539_v52 = vpop.permute.xlu0 %1538 }
0x12d8   :  { %v1544_v30 = vsel %vm589_vm5, %v1539_v52, 0 }
0x12d9   :  { %2739 = vmatpush3.bf16.xpose.msra.mxu0 %v1544_v30  ;;  %v1588_v31 = vpop.permute.xlu1 %1587 }
0x12da   :  { %v1593_v53 = vsel %vm589_vm5, %v1588_v31, 0  ;;  %2750 = vmatprep.subr.bf16.mxu0 %v3005_v15 }
0x12db   :  { %2745 = vmatpush3.bf16.xpose.msra.mxu1 %v1593_v53 }
0x12dc   :  { %2756 = vmatprep.subr.bf16.mxu1 %v3005_v15 }
0x12dd   :  { %v1521_v54 = vpop.permute.xlu1 %1520 }
0x12de   :  { %v1525_v55 = vmul.f32 %v1521_v54, %v3432_v51 }
0x12e0   :  { %2741 = vmatmul.mubr.msk.bf16.vlgmr.msra.gmra.mrb[36].mxu0 %vm589_vm5, %v1533_v57  ;;  %v1530_v59 = vsel %vm1526_vm8, %v1525_v55, 0.0  ;;  %v1793_v18 = vrot.slane %v1525_v55, %v3225_v20 }
0x12e1   :  { %1531 = vadd.xlane.f32.xlu0 %v1530_v59  ;;  %v1519_v60 = vpop.permute.xlu1 %1518  ;;  %2752 = vmatprep.mubr.msk.bf16.mxu0 %vm3006_vm2, %v3005_v15 }
0x12e2   :  { %v1524_v6 = vmul.f32 %v1519_v60, %v3436_v19  ;;  %2747 = vmatmul.mubr.msk.bf16.vlgmr.msra.gmra.mrb[36].mxu1 %vm589_vm5, %v1534_v11 }
0x12e3   :  { %2758 = vmatprep.mubr.msk.bf16.mxu1 %vm3006_vm2, %v3005_v15 }
0x12e4   :  { %v1527_v61 = vsel %vm1526_vm8, %v1524_v6, 0.0  ;;  %v1789_v17 = vrot.slane %v1524_v6, %v3225_v20 }
0x12e5   :  { %1528 = vadd.xlane.f32.xlu0 %v1527_v61  ;;  %v1733_v62 = vpop.permute.xlu1 %1732 }
0x12e6   :  { %v1738_v63 = vsel %vm715_vm7, %v1733_v62, 0 }
0x12e7   :  { %2757 = vmatpush3.bf16.msra.mxu1 %v1738_v63 }
0x12e8   :  { %2768 = vmatprep.subr.bf16.mxu1 %v3005_v15 }
0x12e9   :  { %v1861_v26 = vpop.permute.xlu1 %1860 }
0x12ea   :  { %v1866_v49 = vsel %vm589_vm5, %v1861_v26, 0 }
0x136e   :  { %v3478_v24 = vpop.xlane.xlu0 %1531 }
0x1372   :  { %v3480_v25 = vpop.xlane.xlu0 %1528 }
0x13b3   :  { %v1580_v0 = vpop.f32.mrb[36].mxu0 }
0x13b4   :  { %v1581_v2 = vadd.f32 %v1580_v0, %v3233_v22  ;;  %v2742_v3 = vpop.f32.mrb[37].mxu0 }
0x13b5   :  { %v1583_v4 = vpop.f32.mrb[38].mxu0  ;;  %v1629_v5 = vpop.f32.mrb[36].mxu1 }
0x13b6   :  { %v1630_v7 = vadd.f32 %v1629_v5, %v3238_v23  ;;  %v2743_v8 = vpop.f32.mrb[39].mxu0  ;;  %v2748_v9 = vpop.f32.mrb[37].mxu1  ;;  %v1636_v10 = vsel %vm1635_vm9, %v1581_v2, -inf }
0x13b7   :  { %v1632_v12 = vpop.f32.mrb[38].mxu1  ;;  %1637 = vmax.xlane.f32.xlu0 %v1636_v10 }
0x13b8   :  { %v2749_v13 = vpop.f32.mrb[39].mxu1  ;;  %v1639_v16 = vsel %vm1635_vm9, %v1630_v7, -inf }
0x13b9   :  { %1640 = vmax.xlane.f32.xlu1 %v1639_v16 }
0x13ca   :  { %1809 = vrot.lane.b32.xlu1 %v3424_v46, %s3010_s9 }
0x13cd   :  { %1684 = vrot.lane.b32.xlu0 %v3424_v46, %s3009_s3 }
0x13ce   :  { %1807 = vrot.lane.b32.xlu1 %v1533_v57, %s3011_s10 }
0x13d1   :  { %1858 = vrot.lane.b32.xlu0 %v1534_v11, %s3011_s10 }
0x13d2   :  { %1794 = vrot.lane.b32.xlu1 %v1789_v17, %s3011_s10 }
0x13d5   :  { %1796 = vrot.lane.b32.xlu0 %v1793_v18, %s3011_s10 }
0x1444   :  { %v1638_v27 = vpop.xlane.xlu0 %1637 }
0x1445   :  { %v3483_v28 = vmax.f32 %v1638_v27, %v3480_v25 }
0x1446   :  { %v1641_v29 = vpop.xlane.xlu1 %1640 }
0x1447   :  { %v1644_v21 = vsub.f32 %v3480_v25, %v3483_v28  ;;  %v1650_v14 = vsub.f32 %v1581_v2, %v3483_v28  ;;  %v3489_v32 = vmax.f32 %v1641_v29, %v3478_v24 }
0x1448   :  { %v1685_v33 = vpop.permute.xlu0 %1684 }
0x1449   :  { %v1652_v34 = vmul.f32 1.442695, %v1650_v14  ;;  %v1651_v35 = vsub.f32 %v1630_v7, %v3489_v32  ;;  %v1690_v56 = vsel %vm715_vm7, %v1685_v33, 0 }
0x144a   :  { %v1810_v36 = vpop.permute.xlu1 %1809  ;;  %2751 = vmatpush3.bf16.msra.mxu0 %v1690_v56 }
0x144b   :  { %v1654_v37 = vmul.f32 1.442695, %v1651_v35  ;;  %2927 = vpow2.f32 %v1652_v34  ;;  %2762 = vmatprep.subr.bf16.mxu0 %v3005_v15  ;;  %v1815_v47 = vsel %vm589_vm5, %v1810_v36, 0 }
0x144c   :  { %v1859_v38 = vpop.permute.xlu0 %1858 }
0x144d   :  { %2929 = vpow2.f32 %v1654_v37  ;;  %v1673_v37 = vrot.slane %v3432_v51, %v3225_v20  ;;  %v1645_v51 = vsub.f32 %v3478_v24, %v3489_v32 }
0x144e   :  { %v1808_v58 = vpop.permute.xlu1 %1807 }
0x1450   :  { %v1797_v39 = vpop.permute.xlu0 %1796 }
0x1451   :  { %v1803_v40 = vsel %vm1526_vm8, %v1797_v39, 0.0 }
0x1452   :  { %v1795_v41 = vpop.permute.xlu1 %1794  ;;  %1804 = vadd.xlane.f32.xlu0 %v1803_v40 }
0x1453   :  { %v1800_v42 = vsel %vm1526_vm8, %v1795_v41, 0.0 }
0x1455   :  { %v3496_v43 = vpop.eup %2927 }
0x1456   :  { %1801 = vadd.xlane.f32.xlu0 %v1800_v42  ;;  %v1682_v44 = vpack.c.bf16 %v3496_v43, %v3496_v43 }
0x1457   :  { %v3500_v45 = vpop.eup %2929 }
0x1458   :  { %2753 = vmatmul.mubr.msk.bf16.vlgmr.msra.gmra.mrb[40].mxu0 %vm685_vm6, %v1682_v44  ;;  %v1683_v48 = vpack.c.bf16 %v3500_v45, %v3500_v45  ;;  %v1659_v39 = vsel %vm1635_vm9, %v3500_v45, 0.0 }
0x1459   :  { %2763 = vmatpush3.bf16.xpose.msra.mxu0 %v1815_v47  ;;  %2764 = vmatprep.mubr.msk.bf16.mxu0 %vm3006_vm2, %v3005_v15 }
0x145a   :  { %2759 = vmatmul.mubr.msk.bf16.vlgmr.msra.gmra.mrb[40].mxu1 %vm685_vm6, %v1683_v48  ;;  %2774 = vmatprep.subr.bf16.mxu0 %v3005_v15 }
0x145b   :  { %2769 = vmatpush3.bf16.xpose.msra.mxu1 %v1866_v49  ;;  %2770 = vmatprep.mubr.msk.bf16.mxu1 %vm3006_vm2, %v3005_v15 }
0x145c   :  { %2780 = vmatprep.subr.bf16.mxu1 %v3005_v15 }
0x1460   :  { %2765 = vmatmul.mubr.msk.bf16.vlgmr.msra.gmra.mrb[44].mxu0 %vm589_vm5, %v1808_v58  ;;  %v1656_v58 = vsel %vm1635_vm9, %v3496_v43, 0.0 }
0x1461   :  { %2776 = vmatprep.mubr.msk.bf16.mxu0 %vm3006_vm2, %v3005_v15 }
0x1462   :  { %2771 = vmatmul.mubr.msk.bf16.vlgmr.msra.gmra.mrb[44].mxu1 %vm589_vm5, %v1859_v38  ;;  %v1669_v38 = vrot.slane %v3436_v19, %v3225_v20  ;;  %v1646_v20 = vmul.f32 1.442695, %v1644_v21  ;;  %v1648_v19 = vmul.f32 1.442695, %v1645_v51 }
0x1463   :  { %2782 = vmatprep.mubr.msk.bf16.mxu1 %vm3006_vm2, %v3005_v15 }
0x152b   :  { %v3520_v52 = vpop.f32.mrb[40].mxu0 }
0x152c   :  { %v2754_v30 = vpop.f32.mrb[41].mxu0 }
0x152d   :  { %v1729_v31 = vpop.f32.mrb[42].mxu0  ;;  %v3522_v53 = vpop.f32.mrb[40].mxu1 }
0x152e   :  { %v2755_v54 = vpop.f32.mrb[43].mxu0  ;;  %v2760_v55 = vpop.f32.mrb[41].mxu1 }
0x152f   :  { %v1777_v57 = vpop.f32.mrb[42].mxu1 }
0x1530   :  { %v2761_v59 = vpop.f32.mrb[43].mxu1 }
0x1533   :  { %v1851_v11 = vpop.f32.mrb[44].mxu0 }
0x1534   :  { %v1852_v60 = vadd.f32 %v1851_v11, %v3233_v22  ;;  %v2766_v6 = vpop.f32.mrb[45].mxu0  ;;  %v1805_v22 = vpop.xlane.xlu0 %1804 }
0x1535   :  { %v1854_v61 = vpop.f32.mrb[46].mxu0  ;;  %v1902_v62 = vpop.f32.mrb[44].mxu1 }
0x1536   :  { %v1903_v63 = vadd.f32 %v1902_v62, %v3238_v23  ;;  %v2767_v0 = vpop.f32.mrb[47].mxu0  ;;  %v2772_v2 = vpop.f32.mrb[45].mxu1  ;;  %v1908_v3 = vsel %vm1635_vm9, %v1852_v60, -inf }
0x1537   :  { %v1905_v4 = vpop.f32.mrb[46].mxu1  ;;  %1909 = vmax.xlane.f32.xlu0 %v1908_v3  ;;  %v2863_v0 = vld [vmem:[%s3676_s4 + $0xa4] sm:$0xff]  }
0x1538   :  { %v2773_v5 = vpop.f32.mrb[47].mxu1  ;;  %v1911_v7 = vsel %vm1635_vm9, %v1903_v63, -inf  ;;  %v1802_v8 = vpop.xlane.xlu0 %1801 }
0x1539   :  { %1912 = vmax.xlane.f32.xlu1 %v1911_v7 }
0x154a   :  { %1996 = vrot.lane.b32.xlu1 %v3426_v50, %s3014_s13 }
0x154d   :  { %1948 = vrot.lane.b32.xlu0 %v3424_v46, %s3014_s13 }
0x15c4   :  { %v1910_v9 = vpop.xlane.xlu0 %1909 }
0x15c5   :  { %v1914_v23 = vmax.f32 %v1910_v9, %v1802_v8 }
0x15c6   :  { %v1913_v10 = vpop.xlane.xlu1 %1912 }
0x15c7   :  { %v1916_v12 = vsub.f32 %v1802_v8, %v1914_v23  ;;  %v1922_v13 = vsub.f32 %v1852_v60, %v1914_v23  ;;  %v1915_v16 = vmax.f32 %v1913_v10, %v1805_v22 }
0x15c8   :  { %v1949_v17 = vpop.permute.xlu0 %1948 }
0x15c9   :  { %v1924_v18 = vmul.f32 1.442695, %v1922_v13  ;;  %v1923_v26 = vsub.f32 %v1903_v63, %v1915_v16  ;;  %v1954_v27 = vsel %vm715_vm7, %v1949_v17, 0  ;;  %v1917_v40 = vsub.f32 %v1805_v22, %v1915_v16 }
0x15ca   :  { %v1997_v29 = vpop.permute.xlu1 %1996  ;;  %2775 = vmatpush3.bf16.msra.mxu0 %v1954_v27  ;;  %v1918_v42 = vmul.f32 1.442695, %v1916_v12 }
0x15cb   :  { %v1926_v14 = vmul.f32 1.442695, %v1923_v26  ;;  %v2002_v50 = vsel %vm715_vm7, %v1997_v29, 0  ;;  %2931 = vpow2.f32 %v1924_v18  ;;  %2786 = vmatprep.subr.bf16.mxu0 %v3005_v15  ;;  %v1920_v44 = vmul.f32 1.442695, %v1917_v40 }
0x15cc   :  { %2781 = vmatpush3.bf16.msra.mxu1 %v2002_v50 }
0x15cd   :  { %2794 = vmatprep.subr.bf16.mxu1 %v3005_v15  ;;  %2933 = vpow2.f32 %v1926_v14 }
0x15ce   :  { %2935 = vpow2.f32 %v1646_v20 }
0x15cf   :  { %2937 = vpow2.f32 %v1648_v19 }
0x15d0   :  { %2939 = vpow2.f32 %v1918_v42 }
0x15d1   :  { %2941 = vpow2.f32 %v1920_v44 }
0x15d5   :  { %v2932_v46 = vpop.eup %2931 }
0x15d6   :  { %v1928_v33 = vsel %vm1635_vm9, %v2932_v46, 0.0  ;;  %v1946_v34 = vpack.c.bf16 %v2932_v46, %v2932_v46 }
0x15d7   :  { %v2934_v35 = vpop.eup %2933  ;;  %1929 = vadd.xlane.f32.xlu0 %v1928_v33 }
0x15d8   :  { %2777 = vmatmul.mubr.msk.bf16.vlgmr.msra.gmra.mrb[48].mxu0 %vm685_vm6, %v1946_v34  ;;  %v1931_v56 = vsel %vm1635_vm9, %v2934_v35, 0.0  ;;  %v1947_v36 = vpack.c.bf16 %v2934_v35, %v2934_v35  ;;  %v2936_v48 = vpop.eup %2935 }
0x15d9   :  { %1932 = vadd.xlane.f32.xlu1 %v1931_v56  ;;  %2790 = vmatprep.mubr.msk.bf16.mxu0 %vm3006_vm2, %v3005_v15  ;;  %v2938_v24 = vpop.eup %2937 }
0x15da   :  { %2783 = vmatmul.mubr.msk.bf16.vlgmr.msra.gmra.mrb[48].mxu1 %vm685_vm6, %v1947_v36  ;;  %v2940_v21 = vpop.eup %2939  ;;  %2787 = vmatpush3.bf16.msra.mxu0 %v2863_v0 }
0x15db   :  { %2798 = vmatprep.mubr.msk.bf16.mxu1 %vm3006_vm2, %v3005_v15  ;;  %v2942_v57 = vpop.eup %2941  ;;  %2788 = vmatprep.subr.bf16.mxu0 %v3005_v15 }
0x15ea   :  { %1940 = vrot.lane.b32.xlu1 %v1673_v37, %s3014_s13 }
0x15ed   :  { %1938 = vrot.lane.b32.xlu0 %v1669_v38, %s3014_s13 }
0x160c   :  { %1657 = vadd.xlane.f32.xlu0 %v1656_v58  ;;  %v2506_v58 = vld [vmem:[%s3677_s5 + $0x13] ss:$0 sm:$0xff] }
0x160e   :  { %1660 = vadd.xlane.f32.xlu1 %v1659_v39 }
0x161f   :  { %1676 = vrot.lane.b32.xlu1 %v1673_v37, %s3009_s3 }
0x1622   :  { %1674 = vrot.lane.b32.xlu0 %v1669_v38, %s3009_s3 }
0x1664   :  { %v1930_v41 = vpop.xlane.xlu0 %1929 }
0x1665   :  { %v1934_v54 = vadd.f32 %v2940_v21, %v1930_v41 }
0x1666   :  { %v1933_v43 = vpop.xlane.xlu1 %1932 }
0x1667   :  { %v1935_v60 = vadd.f32 %v2942_v57, %v1933_v43 }
0x1668   :  { %v1939_v45 = vpop.permute.xlu0 %1938 }
0x1669   :  { %v1944_v3 = vmul.f32 %v2940_v21, %v1939_v45  ;;  %v2508_v21 = vld [vmem:[%s3677_s5 + $0x15] ss:$0 sm:$0xff] }
0x166a   :  { %v1941_v47 = vpop.permute.xlu1 %1940 }
0x1699   :  { %v1658_v49 = vpop.xlane.xlu0 %1657 }
0x169a   :  { %v1662_v30 = vadd.f32 %v2936_v48, %v1658_v49 }
0x169b   :  { %v1661_v32 = vpop.xlane.xlu1 %1660 }
0x169c   :  { %2943 = vrcp.f32 %v1662_v30  ;;  %v1663_v25 = vadd.f32 %v2938_v24, %v1661_v32 }
0x169d   :  { %v1675_v28 = vpop.permute.xlu0 %1674 }
0x169e   :  { %2945 = vrcp.f32 %v1663_v25  ;;  %v1680_v31 = vmul.f32 %v2936_v48, %v1675_v28  ;;  %v2866_v48 = vld [vmem:[%s3676_s4 + $0xbc] sm:$0xff]   ;;  %v2507_v25 = vld [vmem:[%s3677_s5 + $0x14] ss:$0 sm:$0xff] }
0x169f   :  { %v1677_v55 = vpop.permute.xlu1 %1676  ;;  %2947 = vrcp.f32 %v1934_v54 }
0x16a0   :  { %v1780_v59 = vadd.f32 %v3520_v52, %v1680_v31  ;;  %v1681_v11 = vmul.f32 %v2938_v24, %v1677_v55  ;;  %2949 = vrcp.f32 %v1935_v60  ;;  %v1945_v52 = vmul.f32 %v2942_v57, %v1941_v47  ;;  %v2867_v57 = vld [vmem:[%s3676_s4 + $0xc4] sm:$0xff]   ;;  %v2870_v60 = vld [vmem:[%s3676_s4 + $0xdc] sm:$0xff]  }
0x16a2   :  { %v1781_v6 = vadd.f32 %v3522_v53, %v1681_v11  ;;  %v2864_v53 = vld [vmem:[%s3676_s4 + $0xac] sm:$0xff]   ;;  %v2869_v11 = vld [vmem:[%s3676_s4 + $0xd4] sm:$0xff]  }
0x16a3   :  { %2789 = vmatpush3.bf16.msra.mxu0 %v2864_v53 }
0x16a4   :  { %2802 = vmatprep.subr.bf16.mxu0 %v3005_v15 }
0x16a6   :  { %v2944_v61 = vpop.eup %2943 }
0x16a7   :  { %v1782_v62 = vmul.f32 %v2944_v61, %v1780_v59  ;;  %v2868_v59 = vld [vmem:[%s3676_s4 + $0xcc] sm:$0xff]  }
0x16a8   :  { %v2946_v63 = vpop.eup %2945 }
0x16a9   :  { %v1783_v2 = vmul.f32 %v2946_v63, %v1781_v6  ;;  %v2948_v22 = vpop.eup %2947  ;;  %v2509_v6 = vld [vmem:[%s3677_s5 + $0x16] ss:$0 sm:$0xff] }
0x16aa   :  { %v2950_v16 = vpop.eup %2949 }
0x16ab   :  { %v1990_v4 = vpop.f32.mrb[48].mxu0 }
0x16ac   :  { %v2044_v5 = vadd.f32 %v1990_v4, %v1944_v3  ;;  %v2778_v7 = vpop.f32.mrb[49].mxu0 }
0x16ad   :  { %v1993_v8 = vpop.f32.mrb[50].mxu0  ;;  %v2038_v9 = vpop.f32.mrb[48].mxu1 }
0x16ae   :  { %v2046_v23 = vmul.f32 %v2948_v22, %v2044_v5  ;;  %v2045_v10 = vadd.f32 %v2038_v9, %v1945_v52  ;;  %v2779_v12 = vpop.f32.mrb[51].mxu0  ;;  %v2784_v13 = vpop.f32.mrb[49].mxu1 }
0x16af   :  { %v2041_v17 = vpop.f32.mrb[50].mxu1 }
0x16b0   :  { %v2047_v18 = vmul.f32 %v2950_v16, %v2045_v10  ;;  %v2785_v26 = vpop.f32.mrb[51].mxu1  ;;  %v2513_v10 = vld [vmem:[%s3677_s5 + $0x17] ss:$0 sm:$0xff] }
0x16b2   :  { %2052 = vrot.lane.b32.xlu1 %v2047_v18, %s3015_s18 }
0x16b6   :  { %2050 = vrot.lane.b32.xlu1 %v2046_v23, %s3015_s18 }
0x1724   :  { %v2053_v27 = vpop.permute.xlu1 %2052 }
0x1725   :  { %v2057_v29 = vsel %vm589_vm5, %v1783_v2, %v2053_v27 }
0x1726   :  { %v2063_v14 = vpack.c.bf16 %v2057_v29, %v2057_v29 }
0x1728   :  { %v2067_v50 = vunpack.c.l.b16 %v2063_v14  ;;  %v2051_v46 = vpop.permute.xlu1 %2050 }
0x1729   :  { %v2056_v33 = vsel %vm589_vm5, %v1782_v62, %v2051_v46 }
0x172a   :  { %v2062_v34 = vpack.c.bf16 %v2056_v33, %v2056_v33  ;;  %v2068_v35 = vrot.slane %v2067_v50, 7 }
0x172c   :  { %v2066_v56 = vunpack.c.l.b16 %v2062_v34  ;;  %v2871_v34 = vld [vmem:[%s3676_s4 + $0xe4] sm:$0xff]  }
0x172e   :  { %v2070_v36 = vsel %vm2069_vm10, %v2068_v35, %v2066_v56  ;;  %v2872_v35 = vld [vmem:[%s3676_s4 + $0xec] sm:$0xff]  }
0x172f   :  { %v2071_v37 = vpack.c.b16 %v2070_v36, %v2070_v36 }
0x1731   :  { %2791 = vmatmul.mubr.msk.bf16.vlgmr.msra.gmra.mrb[52].mxu0 %vm149_vm3, %v2071_v37 }
0x1732   :  { %2810 = vmatprep.mubr.msk.bf16.mxu0 %vm3006_vm2, %v3005_v15  ;;  %2803 = vmatpush3.bf16.msra.mxu0 %v2867_v57 }
0x1733   :  { %2804 = vmatprep.subr.bf16.mxu0 %v3005_v15 }
0x1736   :  { %2805 = vmatpush3.bf16.msra.mxu0 %v2868_v59 }
0x1737   :  { %2806 = vmatprep.subr.bf16.mxu0 %v3005_v15 }
0x173a   :  { %2807 = vmatpush3.bf16.msra.mxu0 %v2869_v11 }
0x173b   :  { %2808 = vmatprep.subr.bf16.mxu0 %v3005_v15 }
0x173e   :  { %2809 = vmatpush3.bf16.msra.mxu0 %v2870_v60 }
0x1804   :  { %v2121_v38 = vpop.f32.mrb[52].mxu0 }
0x1805   :  { %v2127_v39 = vadd.f32 %v3377_v1, %v2121_v38  ;;  %v2792_v51 = vpop.f32.mrb[53].mxu0  ;;  %v2865_v1 = vld [vmem:[%s3676_s4 + $0xb4] sm:$0xff]   ;;  %s3017_s4 = smov [#allocation2]  }
0x1806   :  { %v2124_v20 = vpop.f32.mrb[54].mxu0  ;;  %2795 = vmatpush3.bf16.msra.mxu1 %v2865_v1  ;;  %v2520_v51 = vld [vmem:[%s3677_s5 + $0x1a] ss:$0 sm:$0xff]  ;;  %s2415_s1 = sshll.u32 %s3017_s4, 4  ;;  %s2416_s1 = int_to_ptr.vmem [resolvable:$true] %s2415_s1 }
0x1807   :  { %v3582_v19 = vadd.f32 %v2506_v58, %v2127_v39  ;;  %v2793_v40 = vpop.f32.mrb[55].mxu0  ;;  %2796 = vmatprep.subr.bf16.mxu1 %v3005_v15  ;;  %v2519_v58 = vld [vmem:[%s3677_s5 + $0x19] ss:$0 sm:$0xff]  ;;  %s2957_s11 = scalar_lea.vmem %s2416_s1, 32  ;;  %p2962_p1 = scmp.lt.s32.totalorder %s2416_s1, %s2416_s1 }
0x1808   :  { %p2958_p0 = scmp.ne.s32.totalorder %s2416_s1, %s2957_s11  ;;  %p2963_p2 = scmp.lt.s32.totalorder %s2957_s11, %s2957_s11 }
0x1809   :  { %v2135_v41 = vsel %vm2134_vm11, %v3582_v19, 0.0 }
0x180a   :  { %2136 = vadd.xlane.f32.xlu0 %v2135_v41  ;;  %2797 = vmatpush3.bf16.msra.mxu1 %v2866_v48  ;;  %p2964_p3 = por %p2963_p2, %p2962_p1 }
0x180b   :  { %2814 = vmatprep.subr.bf16.mxu1 %v3005_v15 }
0x180c   :  { %p2965_p4 = pnand %p2964_p3, %p2958_p0 }
0x1897   :  { %v2137_v42 = vpop.xlane.xlu0 %2136 }
0x1898   :  { %v2138_v43 = vmul.f32 0.03125, %v2137_v42 }
0x189a   :  { %v2139_v44 = vsub.f32 %v3582_v19, %v2138_v43 }
0x189c   :  { %v2140_v45 = vmul.f32 %v2139_v44, %v2139_v44 }
0x189e   :  { %v2141_v47 = vsel %vm2134_vm11, %v2140_v45, 0.0 }
0x189f   :  { %2142 = vadd.xlane.f32.xlu1 %v2141_v47 }
0x192c   :  { %v2143_v49 = vpop.xlane.xlu1 %2142 }
0x192d   :  { %v2144_v30 = vmul.f32 0.03125, %v2143_v49 }
0x192f   :  { %v2145_v24 = vadd.f32 1e-05, %v2144_v30 }
0x1931   :  { %2951 = vrsqrt.f32 %v2145_v24 }
0x193b   :  { %v2952_v32 = vpop.eup %2951 }
0x193c   :  { %v2147_v28 = vmul.f32 %v2952_v32, %v2139_v44 }
0x193e   :  { %v2153_v31 = vmul.f32 %v2507_v25, %v2147_v28 }
0x1940   :  { %v2159_v54 = vadd.f32 %v2508_v21, %v2153_v31 }
0x1942   :  { %v2164_v55 = vpack.c.bf16 %v2159_v54, %v2159_v54 }
0x1944   :  { %2799 = vmatmul.mubr.msk.bf16.vlgmr.msra.gmra.mrb[52].mxu1 %vm149_vm3, %v2164_v55 }
0x1945   :  { %2818 = vmatprep.mubr.msk.bf16.mxu1 %vm3006_vm2, %v3005_v15  ;;  %2815 = vmatpush3.bf16.msra.mxu1 %v2871_v34 }
0x1946   :  { %2816 = vmatprep.subr.bf16.mxu1 %v3005_v15 }
0x1949   :  { %2817 = vmatpush3.bf16.msra.mxu1 %v2872_v35 }
0x1a17   :  { %v2219_v61 = vpop.f32.mrb[52].mxu1 }
0x1a18   :  { %v2220_v62 = vadd.f32 %v2509_v6, %v2219_v61  ;;  %v2800_v63 = vpop.f32.mrb[53].mxu1 }
0x1a19   :  { %v2222_v0 = vpop.f32.mrb[54].mxu1 }
0x1a1a   :  { %v2226_v2 = vmul.f32 0.044715, %v2220_v62  ;;  %v2801_v3 = vpop.f32.mrb[55].mxu1  ;;  %v2225_v22 = vmul.f32 0.5, %v2220_v62 }
0x1a1c   :  { %v2227_v4 = vmul.f32 %v2226_v2, %v2220_v62 }
0x1a1e   :  { %v2228_v52 = vmul.f32 %v2227_v4, %v2220_v62 }
0x1a20   :  { %v2229_v5 = vadd.f32 %v2228_v52, %v2220_v62 }
0x1a22   :  { %v2230_v7 = vmul.f32 0.7978846, %v2229_v5 }
0x1a24   :  { %2953 = vtanh.f32 %v2230_v7 }
0x1a2e   :  { %v2954_v53 = vpop.eup %2953 }
0x1a2f   :  { %v2232_v8 = vadd.f32 1.0, %v2954_v53 }
0x1a31   :  { %v2233_v9 = vmul.f32 %v2232_v8, %v2225_v22 }
0x1a33   :  { %v2242_v23 = vpack.c.bf16 %v2233_v9, %v2233_v9 }
0x1a35   :  { %2811 = vmatmul.mubr.msk.bf16.vlgmr.msra.gmra.mrb[56].mxu0 %vm411_vm4, %v2242_v23 }
0x1b08   :  { %v2309_v12 = vpop.f32.mrb[56].mxu0 }
0x1b09   :  { %v2310_v13 = vadd.f32 %v2513_v10, %v2309_v12  ;;  %v2812_v16 = vpop.f32.mrb[57].mxu0 }
0x1b0a   :  { %v2312_v17 = vpop.f32.mrb[58].mxu0 }
0x1b0b   :  { %v2813_v18 = vpop.f32.mrb[59].mxu0  ;;  %v2315_v26 = vadd.f32 %v2310_v13, %v3582_v19 }
0x1b0d   :  { %v2316_v27 = vsel %vm2134_vm11, %v2315_v26, 0.0 }
0x1b0e   :  { %2317 = vadd.xlane.f32.xlu0 %v2316_v27 }
0x1b9b   :  { %v2318_v29 = vpop.xlane.xlu0 %2317 }
0x1b9c   :  { %v2319_v14 = vmul.f32 0.03125, %v2318_v29 }
0x1b9e   :  { %v2320_v50 = vsub.f32 %v2315_v26, %v2319_v14 }
0x1ba0   :  { %v2321_v46 = vmul.f32 %v2320_v50, %v2320_v50 }
0x1ba2   :  { %v2322_v33 = vsel %vm2134_vm11, %v2321_v46, 0.0 }
0x1ba3   :  { %2323 = vadd.xlane.f32.xlu0 %v2322_v33 }
0x1c30   :  { %v2324_v56 = vpop.xlane.xlu0 %2323 }
0x1c31   :  { %v2325_v36 = vmul.f32 0.03125, %v2324_v56 }
0x1c33   :  { %v2326_v37 = vadd.f32 1e-05, %v2325_v36 }
0x1c35   :  { %2955 = vrsqrt.f32 %v2326_v37 }
0x1c3f   :  { %v2956_v38 = vpop.eup %2955 }
0x1c40   :  { %v2328_v39 = vmul.f32 %v2956_v38, %v2320_v50 }
0x1c42   :  { %v2334_v15 = vmul.f32 %v2519_v58, %v2328_v39 }
0x1c44   :  { %v2340_v20 = vadd.f32 %v2520_v51, %v2334_v15 }
0x1c46   :  { %v2346_v19 = vpack.c.bf16 %v2340_v20, %v2340_v20  ;;  %2341 = vst.msk [vmem:[#allocation2] sm:$0x3] %vm2134_vm11, %v2340_v20 }
0x1c48   :  { %2819 = vmatmul.mubr.msk.bf16.vlgmr.msra.gmra.mrb[56].mxu1 %vm149_vm3, %v2346_v19 }
0x1c49   :  { %2968 = shalt.err (!%p2965_p4)
}
0x1c4a   :  { %s2969_s15 = scalar_lea.hbm %s3678_s6, 32 }
0x1c4b   :  { %p2970_p5 = scmp.ne.s32.totalorder %s3678_s6, %s2969_s15  ;;  %p2973_p6 = scmp.lt.u32.totalorder %s2969_s15, %s3678_s6 }
0x1c4d   :  { %p2975_p7 = pnand %p2973_p6, %p2970_p5 }
0x1c4f   :  { %2978 = shalt.err (!%p2975_p7)
}
0x1c50   :  { %2418 = dma.vmem_to_hbm [thread:$0]  %s2416_s1, 32, %s3678_s6, [#allocation3]   ;;  %v2521_v40 = vld [vmem:[%s3677_s5 + $0x1b] ss:$0 sm:$0xff]  ;;  %vm2407_vm12 = vcmask 9216  }
0x1c51   :  { %s3018_s24 = smov [#allocation4]  }
0x1c52   :  { %s2425_s25 = sshll.u32 %s3018_s24, 4  ;;  %s2426_s25 = int_to_ptr.vmem [resolvable:$true] %s2425_s25 }
0x1c53   :  { %s2979_s26 = scalar_lea.vmem %s2426_s25, 32  ;;  %p2984_p9 = scmp.lt.s32.totalorder %s2426_s25, %s2426_s25 }
0x1c54   :  { %p2980_p8 = scmp.ne.s32.totalorder %s2426_s25, %s2979_s26  ;;  %p2985_p10 = scmp.lt.s32.totalorder %s2979_s26, %s2979_s26 }
0x1c56   :  { %p2986_p11 = por %p2985_p10, %p2984_p9 }
0x1c58   :  { %p2987_p12 = pnand %p2986_p11, %p2980_p8 }
0x1d1b   :  { %v2401_v41 = vpop.f32.mrb[56].mxu1 }
0x1d1c   :  { %v2402_v42 = vadd.f32 %v2521_v40, %v2401_v41  ;;  %v2820_v43 = vpop.f32.mrb[57].mxu1 }
0x1d1d   :  { %v2404_v44 = vpop.f32.mrb[58].mxu1 }
0x1d1e   :  { %v2821_v45 = vpop.f32.mrb[59].mxu1  ;;  %2408 = vst.msk [vmem:[#allocation4] sm:$0x3] %vm2407_vm12, %v2402_v42 }
0x1d1f   :  { %2990 = shalt.err (!%p2987_p12)
}
0x1d20   :  { %s2991_s5 = scalar_lea.hbm %s3679_s7, 32 }
0x1d21   :  { %p2992_p13 = scmp.ne.s32.totalorder %s3679_s7, %s2991_s5  ;;  %p2995_p0 = scmp.lt.u32.totalorder %s2991_s5, %s3679_s7 }
0x1d23   :  { %p2997_p1 = pnand %p2995_p0, %p2992_p13 }
0x1d25   :  { %3000 = shalt.err (!%p2997_p1)
}
0x1d26   :  { %2428 = dma.vmem_to_hbm [thread:$0]  %s2426_s25, 32, %s3679_s7, [#allocation5]  }
0x1d27   :  { %3001 = dma.done.wait [#allocation3], 32  }
0x1d28   :  { %3002 = vsyncadd [#allocation3], 4294967264 }
0x1d29   :  { %3003 = dma.done.wait [#allocation5], 32  }
0x1d2a   :  { %3004 = vsyncadd [#allocation5], 4294967264 }
0x1d2b   :  { %2435 = vsyncpa [#allocation3], 1 }
0x1d2c   :  { %2436 = vsyncpa [#allocation5], 1 }

</bundles_post_ra>
